<compile_context>
chip_gen: v7x
topology: tpu7x:2x2x1
jax: 0.10.0
libtpu: 0.0.40
codegen_flags: <defaults>
</compile_context>

<pallas_src>
import numpy as np
import jax
import jax.numpy as jnp
from jax.experimental import pallas as pl
from jax.experimental.pallas import tpu as pltpu

_EPS = 1e-6
_BIG = 1e9      # sentinel instance key for unmatched / padded points


def _geo_kernel(lhs_ref, rhs_ref, out_ref):
    """Grid = (batch, Q-row-tile).

    lhs: (TQ, 9) per-point columns of the current row tile:
         [Px, Py, Tx, Ty, OPx, OPy, OTx, OTy, a],  a = inst id or +BIG.
    rhs: (17, Qp) lane-dense per-point rows of the whole sample:
         0:4  [OPx, OPy, OTx, OTy]        (dot-matmul RHS base)
         4:8  [OPy, -OPx, OTy, -OTx]      (cross-matmul RHS base)
         8:12 [Px, Py, Tx, Ty]
        12:16 [ROPx, ROPy, ROTx, ROTy]    (rolled offsets, intra only)
        16    b = inst id or -BIG.
    out: (1, 1, 8, 128)  row 0 = inter masked sum (this tile),
                         row 1 = intra masked sum (whole sample).
    """
    lhs = lhs_ref[0]                       # (TQ, 9)
    rhs = rhs_ref[0]                       # (17, Qp)
    tq = lhs.shape[0]
    qp = rhs.shape[-1]

    # ---- per-column (lane-dense) offset norms, shared intra/inter ----------
    opx_c, opy_c = rhs[0:1, :], rhs[1:2, :]
    otx_c, oty_c = rhs[2:3, :], rhs[3:4, :]
    len_p = jnp.sqrt(opx_c * opx_c + opy_c * opy_c)        # (1, Qp)
    len_t = jnp.sqrt(otx_c * otx_c + oty_c * oty_c)
    inv_r_p = pl.reciprocal(len_p + _EPS, approx=False)    # O(Q) divides only
    inv_r_t = pl.reciprocal(len_t + _EPS, approx=False)

    brow = rhs[16:17, :]                                   # (1, Qp) key row

    # ---- intra (Euclidean shape): lane-dense (1, Qp); wrapper reads tile 0 --
    ropx, ropy = rhs[12:13, :], rhs[13:14, :]
    rotx, roty = rhs[14:15, :], rhs[15:16, :]
    rlen_p = jnp.sqrt(ropx * ropx + ropy * ropy)
    rlen_t = jnp.sqrt(rotx * rotx + roty * roty)
    inv_pp = pl.reciprocal(len_p * rlen_p + _EPS, approx=False)
    inv_tt = pl.reciprocal(len_t * rlen_t + _EPS, approx=False)
    dot_p = (opx_c * ropx + opy_c * ropy) * inv_pp
    crs_p = (opx_c * ropy - opy_c * ropx) * inv_pp
    dot_t = (otx_c * rotx + oty_c * roty) * inv_tt
    crs_t = (otx_c * roty - oty_c * rotx) * inv_tt
    intra_abs = (jnp.abs(len_p - len_t) + jnp.abs(dot_p - dot_t)
                 + jnp.abs(crs_p - crs_t))
    intra_sum = jnp.sum(jnp.where(brow >= 0.0, intra_abs, 0.0))

    # ---- inter (Euclidean relation) ----------------------------------------
    acol = lhs[:, 8:9]                                     # (TQ, 1) key col
    mask = acol < brow               # strict src_inst < tgt_inst, matched only

    # pairwise point distances: exact f32 broadcast-diff on the VPU
    px_c, py_c = rhs[8:9, :], rhs[9:10, :]
    tx_c, ty_c = rhs[10:11, :], rhs[11:12, :]
    dxp = lhs[:, 0:1] - px_c
    dyp = lhs[:, 1:2] - py_c
    l_pred = jnp.sqrt(dxp * dxp + dyp * dyp)
    dxt = lhs[:, 2:3] - tx_c
    dyt = lhs[:, 3:4] - ty_c
    l_tgt = jnp.sqrt(dxt * dxt + dyt * dyt)
    inter_sum = jnp.sum(jnp.where(mask, jnp.abs(l_pred - l_tgt), 0.0))

    # per-row offset norms / separable reciprocals (O(TQ), not O(TQ*Q))
    opx_r, opy_r = lhs[:, 4:5], lhs[:, 5:6]
    otx_r, oty_r = lhs[:, 6:7], lhs[:, 7:8]
    onc_p = jnp.sqrt(opx_r * opx_r + opy_r * opy_r)        # (TQ, 1)
    onc_t = jnp.sqrt(otx_r * otx_r + oty_r * oty_r)
    inv_c_p = pl.reciprocal(onc_p + _EPS, approx=False)
    inv_c_t = pl.reciprocal(onc_t + _EPS, approx=False)

    # fused (pred - target) dot / cross matmuls, K=4, default precision:
    # operands are unit offset directions, so outputs are cos/sin differences
    # in [-2, 2] (well conditioned for the single-pass MXU).
    col4 = jax.lax.broadcasted_iota(jnp.int32, (tq, 4), 1)
    a_lhs = lhs[:, 4:8] * jnp.where(col4 < 2, inv_c_p, -inv_c_t)   # (TQ, 4)
    row4 = jax.lax.broadcasted_iota(jnp.int32, (4, qp), 0)
    rscale = jnp.where(row4 < 2, inv_r_p, inv_r_t)                 # (4, Qp)
    d_diff = jnp.dot(a_lhs, rhs[0:4, :] * rscale,
                     preferred_element_type=jnp.float32)           # (TQ, Qp)
    c_diff = jnp.dot(a_lhs, rhs[4:8, :] * rscale,
                     preferred_element_type=jnp.float32)
    inter_sum = inter_sum + jnp.sum(jnp.where(mask, jnp.abs(d_diff), 0.0))
    inter_sum = inter_sum + jnp.sum(jnp.where(mask, jnp.abs(c_diff), 0.0))

    # TODO(synk): exploit the strict block-triangular mask at tile granularity
    # (skip fully masked (row-tile, col-tile) pairs) for up to ~2x inter work.

    row = jax.lax.broadcasted_iota(jnp.int32, (8, 128), 0)
    vals = jnp.where(row == 0, inter_sum, jnp.where(row == 1, intra_sum, 0.0))
    out_ref[...] = vals[None, None]


def geometric_loss_pallas(pred, target, labels, *,
                          num_ins, num_pts, num_classes,
                          pc_range=(-15.0, -30.0, -2.0, 15.0, 30.0, 2.0),
                          loss_weight=1.0, intra_loss_weight=1.0,
                          inter_loss_weight=1.0):
    pred = pred.astype(jnp.float32)
    target = target.astype(jnp.float32)
    BN, Nv, _ = pred.shape
    assert Nv == num_pts and BN % num_ins == 0
    B, I = BN // num_ins, num_ins
    Q = I * Nv
    pc = pc_range

    # normalize_2d_pts (glue)
    nt = jnp.stack([(target[..., 0] - pc[0]) / (pc[3] - pc[0]),
                    (target[..., 1] - pc[1]) / (pc[4] - pc[1])], axis=-1)

    matched = labels < num_classes                                   # (BN,)
    m_b = matched.reshape(B, I)

    rp = pred.reshape(B, I, Nv, 2)
    rt = nt.reshape(B, I, Nv, 2)
    orp = rp - jnp.roll(rp, 1, axis=2)                               # offsets
    ort = rt - jnp.roll(rt, 1, axis=2)
    rorp = jnp.roll(orp, 1, axis=2)                                  # rolled
    rort = jnp.roll(ort, 1, axis=2)

    flat = lambda x: x.reshape(B, Q, 2)
    P, T, OP, OT, ROP, ROT = map(flat, (rp, rt, orp, ort, rorp, rort))

    # encoded mask keys: matched -> instance id, unmatched/padded -> +/-BIG
    m_pts = jnp.repeat(m_b, Nv, axis=1)                              # (B, Q)
    inst_f = jnp.asarray(np.repeat(np.arange(I, dtype=np.float32), Nv))
    inst_f = jnp.broadcast_to(inst_f, (B, Q))
    acol = jnp.where(m_pts, inst_f, jnp.float32(_BIG))               # (B, Q)
    brow = jnp.where(m_pts, inst_f, jnp.float32(-_BIG))              # (B, Q)

    # pad Q to a lane multiple; padded points carry sentinel keys -> masked.
    Qp = ((Q + 127) // 128) * 128
    padn = Qp - Q
    if padn:
        pad2 = lambda x: jnp.pad(x, ((0, 0), (0, padn), (0, 0)))
        P, T, OP, OT, ROP, ROT = map(pad2, (P, T, OP, OT, ROP, ROT))
        acol = jnp.pad(acol, ((0, 0), (0, padn)), constant_values=_BIG)
        brow = jnp.pad(brow, ((0, 0), (0, padn)), constant_values=-_BIG)

    # coalesced slabs
    lhs = jnp.concatenate([P, T, OP, OT, acol[..., None]], axis=-1)  # (B,Qp,9)
    tr = lambda x: jnp.swapaxes(x, 1, 2)                             # (B,2,Qp)
    OPt, OTt = tr(OP), tr(OT)
    rhs = jnp.concatenate(
        [OPt, OTt,                                                   # 0:4
         OPt[:, 1:2], -OPt[:, 0:1], OTt[:, 1:2], -OTt[:, 0:1],       # 4:8
         tr(P), tr(T),                                               # 8:12
         tr(ROP), tr(ROT),                                           # 12:16
         brow[:, None, :]],                                          # 16
        axis=1)                                                      # (B,17,Qp)

    TQ = 256 if Qp % 256 == 0 else 128
    n_tiles = Qp // TQ

    sums = pl.pallas_call(
        _geo_kernel,
        grid=(B, n_tiles),
        in_specs=[pl.BlockSpec((1, TQ, 9), lambda b, t: (b, t, 0)),
                  pl.BlockSpec((1, 17, Qp), lambda b, t: (b, 0, 0))],
        out_specs=pl.BlockSpec((1, 1, 8, 128), lambda b, t: (b, t, 0, 0)),
        out_shape=jax.ShapeDtypeStruct((B, n_tiles, 8, 128), jnp.float32),
        compiler_params=pltpu.CompilerParams(
            dimension_semantics=("parallel", "parallel")),
    )(lhs, rhs)

    inter_sums = jnp.sum(sums[:, :, 0, 0], axis=1)                   # (B,)
    intra_sums = sums[:, 0, 1, 0]                    # identical in every tile

    m_count_b = jnp.sum(m_b.astype(jnp.float32), axis=1)             # (B,)
    m_total = jnp.sum(m_count_b)
    # 'mean' reduction: masked sums / element counts (matches the torch code).
    # TODO(synk): a batch with zero matched instances yields NaN, exactly like
    # the torch reference (mean of an empty tensor); guard upstream if needed.
    intra_loss = jnp.sum(intra_sums) / (m_total * Nv)
    inter_loss = jnp.sum(inter_sums / (m_count_b * m_count_b * (Nv * Nv)))
    return loss_weight * (intra_loss_weight * intra_loss
                          + inter_loss_weight * inter_loss)


# ----------------------- numpy reference (mirrors the torch code) ----------
def _reference(pred, target, labels, num_ins, num_pts, num_classes, pc,
               loss_weight, intra_w, inter_w):
    pred = np.asarray(pred, np.float32)
    target = np.asarray(target, np.float32)
    labels = np.asarray(labels)
    nt = target.copy()
    nt[..., 0] = (target[..., 0] - pc[0]) / (pc[3] - pc[0])
    nt[..., 1] = (target[..., 1] - pc[1]) / (pc[4] - pc[1])

    def intra(x):
        off = x - np.roll(x, 1, axis=1)
        rl = np.roll(off, 1, axis=1)
        ln = np.linalg.norm(off, axis=-1)
        norms = ln * np.linalg.norm(rl, axis=-1)
        dots = np.sum(off * rl, -1) / (norms + _EPS)
        crs = (off[..., 0] * rl[..., 1] - off[..., 1] * rl[..., 0]) / (norms + _EPS)
        return ln.reshape(-1), dots.reshape(-1), crs.reshape(-1)

    sel = labels < num_classes
    lp, dp, cp = intra(pred[sel])
    lt, dt, ct = intra(nt[sel])
    intra_loss = (np.mean(np.abs(lp - lt)) + np.mean(np.abs(dp - dt))
                  + np.mean(np.abs(cp - ct)))

    rp = pred.reshape(-1, num_ins, num_pts, 2)
    rt = nt.reshape(-1, num_ins, num_pts, 2)
    rl = labels.reshape(-1, num_ins)
    orp = rp - np.roll(rp, 1, axis=2)
    ort = rt - np.roll(rt, 1, axis=2)

    def inter(x, off):
        M = x.shape[0]
        mask = np.ones((M, M), np.float32)
        for i in range(M):
            mask[i, i:] = 0
        mflat = mask.reshape(-1)
        xs = np.tile(x, (M, 1, 1))
        xt = np.concatenate([np.tile(x[i:i + 1], (M, 1, 1)) for i in range(M)], 0)
        L = np.linalg.norm(xs[:, :, None, :] - xt[:, None, :, :], axis=-1) \
            * mflat[:, None, None]
        os_ = np.tile(off, (M, 1, 1))
        ot_ = np.concatenate([np.tile(off[i:i + 1], (M, 1, 1)) for i in range(M)], 0)
        otc = np.stack([ot_[..., 1], -ot_[..., 0]], -1)
        norms = np.matmul(np.linalg.norm(os_, axis=-1)[:, :, None],
                          np.linalg.norm(ot_, axis=-1)[:, None, :])
        D = np.matmul(os_, np.swapaxes(ot_, -1, -2)) * mflat[:, None, None]
        D = D / (norms + _EPS)
        C = np.matmul(os_, np.swapaxes(otc, -1, -2)) * mflat[:, None, None]
        C = C / (norms + _EPS)
        return L.reshape(-1), D.reshape(-1), C.reshape(-1)

    inter_loss = 0.0
    for b in range(rp.shape[0]):
        selb = rl[b] < num_classes
        Lp, Dp, Cp = inter(rp[b][selb], orp[b][selb])
        Lt, Dt, Ct = inter(rt[b][selb], ort[b][selb])
        inter_loss += (np.mean(np.abs(Lp - Lt)) + np.mean(np.abs(Dp - Dt))
                       + np.mean(np.abs(Cp - Ct)))
    return loss_weight * (intra_w * intra_loss + inter_w * inter_loss)


if __name__ == "__main__":
    B, num_ins, num_pts, num_classes = 2, 8, 8, 3
    pc_range = (-15.0, -30.0, -2.0, 15.0, 30.0, 2.0)

    key = jax.random.PRNGKey(0)
    k1, k2 = jax.random.split(key)
    pred = jax.random.uniform(k1, (B * num_ins, num_pts, 2), jnp.float32)
    u = jax.random.uniform(k2, (B * num_ins, num_pts, 2), jnp.float32)
    target = u * jnp.array([30.0, 60.0]) + jnp.array([-15.0, -30.0])
    # labels in {0..num_classes+1}; values >= num_classes mark unmatched.
    labels = jnp.asarray(np.arange(B * num_ins) % (num_classes + 2),
                         dtype=jnp.int32)

    loss = geometric_loss_pallas(
        pred, target, labels,
        num_ins=num_ins, num_pts=num_pts, num_classes=num_classes,
        pc_range=pc_range, loss_weight=1.0,
        intra_loss_weight=1.0, inter_loss_weight=1.0)
    loss = jax.block_until_ready(loss)

    ref = _reference(pred, target, labels, num_ins, num_pts, num_classes,
                     pc_range, 1.0, 1.0, 1.0)
    assert np.isfinite(float(loss))
    np.testing.assert_allclose(float(loss), float(ref), rtol=2e-3, atol=1e-3)
    print("KERNEL_OK")
</pallas_src>

<mosaic_0001>
module attributes {stable_mosaic.version = 11 : i64} {
  func.func @_geo_kernel(%arg0: i32, %arg1: i32, %arg2: memref<1x128x9xf32, #tpu.memory_space<vmem>>, %arg3: memref<1x17x128xf32, #tpu.memory_space<vmem>>, %arg4: memref<1x1x8x128xf32, #tpu.memory_space<vmem>>) attributes {dimension_semantics = [#tpu.dimension_semantics<parallel>, #tpu.dimension_semantics<parallel>], iteration_bounds = array<i64: 2, 1>, scalar_prefetch = 0 : i64, scratch_operands = 0 : i64, tpu.core_type = #tpu.core_type<tc>, window_params = [{transform_indices = @transform_0, window_bounds = array<i64: 1, 128, 9>}, {transform_indices = @transform_1, window_bounds = array<i64: 1, 17, 128>}, {transform_indices = @transform_2, window_bounds = array<i64: 1, 1, 8, 128>}]} {
    %c0 = arith.constant 0 : index
    %c0_0 = arith.constant 0 : index
    %c0_1 = arith.constant 0 : index
    %0 = vector.load %arg2[%c0, %c0_0, %c0_1] : memref<1x128x9xf32, #tpu.memory_space<vmem>>, vector<1x128x9xf32>
    %1 = vector.shape_cast %0 : vector<1x128x9xf32> to vector<128x9xf32>
    %c0_2 = arith.constant 0 : index
    %c0_3 = arith.constant 0 : index
    %c0_4 = arith.constant 0 : index
    %2 = vector.load %arg3[%c0_2, %c0_3, %c0_4] : memref<1x17x128xf32, #tpu.memory_space<vmem>>, vector<1x17x128xf32>
    %3 = vector.shape_cast %2 : vector<1x17x128xf32> to vector<17x128xf32>
    %4 = vector.extract_strided_slice %3 {offsets = [0, 0], sizes = [1, 128], strides = [1, 1]} : vector<17x128xf32> to vector<1x128xf32>
    %5 = vector.extract_strided_slice %3 {offsets = [1, 0], sizes = [1, 128], strides = [1, 1]} : vector<17x128xf32> to vector<1x128xf32>
    %6 = vector.extract_strided_slice %3 {offsets = [2, 0], sizes = [1, 128], strides = [1, 1]} : vector<17x128xf32> to vector<1x128xf32>
    %7 = vector.extract_strided_slice %3 {offsets = [3, 0], sizes = [1, 128], strides = [1, 1]} : vector<17x128xf32> to vector<1x128xf32>
    %8 = arith.mulf %4, %4 : vector<1x128xf32>
    %9 = arith.mulf %5, %5 : vector<1x128xf32>
    %10 = arith.addf %8, %9 : vector<1x128xf32>
    %11 = math.sqrt %10 : vector<1x128xf32>
    %12 = arith.mulf %6, %6 : vector<1x128xf32>
    %13 = arith.mulf %7, %7 : vector<1x128xf32>
    %14 = arith.addf %12, %13 : vector<1x128xf32>
    %15 = math.sqrt %14 : vector<1x128xf32>
    %cst = arith.constant 9.99999997E-7 : f32
    %16 = vector.broadcast %cst : f32 to vector<1x128xf32>
    %17 = arith.addf %11, %16 : vector<1x128xf32>
    %18 = tpu.reciprocal %17 : vector<1x128xf32> -> vector<1x128xf32>
    %cst_5 = arith.constant 9.99999997E-7 : f32
    %19 = vector.broadcast %cst_5 : f32 to vector<1x128xf32>
    %20 = arith.addf %15, %19 : vector<1x128xf32>
    %21 = tpu.reciprocal %20 : vector<1x128xf32> -> vector<1x128xf32>
    %22 = vector.extract_strided_slice %3 {offsets = [16, 0], sizes = [1, 128], strides = [1, 1]} : vector<17x128xf32> to vector<1x128xf32>
    %23 = vector.extract_strided_slice %3 {offsets = [12, 0], sizes = [1, 128], strides = [1, 1]} : vector<17x128xf32> to vector<1x128xf32>
    %24 = vector.extract_strided_slice %3 {offsets = [13, 0], sizes = [1, 128], strides = [1, 1]} : vector<17x128xf32> to vector<1x128xf32>
    %25 = vector.extract_strided_slice %3 {offsets = [14, 0], sizes = [1, 128], strides = [1, 1]} : vector<17x128xf32> to vector<1x128xf32>
    %26 = vector.extract_strided_slice %3 {offsets = [15, 0], sizes = [1, 128], strides = [1, 1]} : vector<17x128xf32> to vector<1x128xf32>
    %27 = arith.mulf %23, %23 : vector<1x128xf32>
    %28 = arith.mulf %24, %24 : vector<1x128xf32>
    %29 = arith.addf %27, %28 : vector<1x128xf32>
    %30 = math.sqrt %29 : vector<1x128xf32>
    %31 = arith.mulf %25, %25 : vector<1x128xf32>
    %32 = arith.mulf %26, %26 : vector<1x128xf32>
    %33 = arith.addf %31, %32 : vector<1x128xf32>
    %34 = math.sqrt %33 : vector<1x128xf32>
    %35 = arith.mulf %11, %30 : vector<1x128xf32>
    %cst_6 = arith.constant 9.99999997E-7 : f32
    %36 = vector.broadcast %cst_6 : f32 to vector<1x128xf32>
    %37 = arith.addf %35, %36 : vector<1x128xf32>
    %38 = tpu.reciprocal %37 : vector<1x128xf32> -> vector<1x128xf32>
    %39 = arith.mulf %15, %34 : vector<1x128xf32>
    %cst_7 = arith.constant 9.99999997E-7 : f32
    %40 = vector.broadcast %cst_7 : f32 to vector<1x128xf32>
    %41 = arith.addf %39, %40 : vector<1x128xf32>
    %42 = tpu.reciprocal %41 : vector<1x128xf32> -> vector<1x128xf32>
    %43 = arith.mulf %4, %23 : vector<1x128xf32>
    %44 = arith.mulf %5, %24 : vector<1x128xf32>
    %45 = arith.addf %43, %44 : vector<1x128xf32>
    %46 = arith.mulf %45, %38 : vector<1x128xf32>
    %47 = arith.mulf %4, %24 : vector<1x128xf32>
    %48 = arith.mulf %5, %23 : vector<1x128xf32>
    %49 = arith.subf %47, %48 : vector<1x128xf32>
    %50 = arith.mulf %49, %38 : vector<1x128xf32>
    %51 = arith.mulf %6, %25 : vector<1x128xf32>
    %52 = arith.mulf %7, %26 : vector<1x128xf32>
    %53 = arith.addf %51, %52 : vector<1x128xf32>
    %54 = arith.mulf %53, %42 : vector<1x128xf32>
    %55 = arith.mulf %6, %26 : vector<1x128xf32>
    %56 = arith.mulf %7, %25 : vector<1x128xf32>
    %57 = arith.subf %55, %56 : vector<1x128xf32>
    %58 = arith.mulf %57, %42 : vector<1x128xf32>
    %59 = arith.subf %11, %15 : vector<1x128xf32>
    %60 = math.absf %59 : vector<1x128xf32>
    %61 = arith.subf %46, %54 : vector<1x128xf32>
    %62 = math.absf %61 : vector<1x128xf32>
    %63 = arith.addf %60, %62 : vector<1x128xf32>
    %64 = arith.subf %50, %58 : vector<1x128xf32>
    %65 = math.absf %64 : vector<1x128xf32>
    %66 = arith.addf %63, %65 : vector<1x128xf32>
    %cst_8 = arith.constant 0.000000e+00 : f32
    %67 = vector.broadcast %cst_8 : f32 to vector<1x128xf32>
    %68 = arith.cmpf oge, %22, %67 : vector<1x128xf32>
    %cst_9 = arith.constant 0.000000e+00 : f32
    %69 = vector.broadcast %cst_9 : f32 to vector<1x128xf32>
    %70 = arith.select %68, %66, %69 : vector<1x128xi1>, vector<1x128xf32>
    %71 = vector.shape_cast %70 : vector<1x128xf32> to vector<1x1x128xf32>
    %cst_10 = arith.constant dense<0.000000e+00> : vector<1xf32>
    %72 = vector.multi_reduction <add>, %71, %cst_10 [1, 2] : vector<1x1x128xf32> to vector<1xf32>
    %73 = vector.shape_cast %72 : vector<1xf32> to vector<1x1x1xf32>
    %74 = vector.extract %73[0, 0, 0] : f32 from vector<1x1x1xf32>
    %75 = vector.extract_strided_slice %1 {offsets = [0, 8], sizes = [128, 1], strides = [1, 1]} : vector<128x9xf32> to vector<128x1xf32>
    %76 = vector.broadcast %75 : vector<128x1xf32> to vector<128x128xf32>
    %77 = vector.broadcast %22 : vector<1x128xf32> to vector<128x128xf32>
    %78 = arith.cmpf olt, %76, %77 : vector<128x128xf32>
    %79 = vector.extract_strided_slice %3 {offsets = [8, 0], sizes = [1, 128], strides = [1, 1]} : vector<17x128xf32> to vector<1x128xf32>
    %80 = vector.extract_strided_slice %3 {offsets = [9, 0], sizes = [1, 128], strides = [1, 1]} : vector<17x128xf32> to vector<1x128xf32>
    %81 = vector.extract_strided_slice %3 {offsets = [10, 0], sizes = [1, 128], strides = [1, 1]} : vector<17x128xf32> to vector<1x128xf32>
    %82 = vector.extract_strided_slice %3 {offsets = [11, 0], sizes = [1, 128], strides = [1, 1]} : vector<17x128xf32> to vector<1x128xf32>
    %83 = vector.extract_strided_slice %1 {offsets = [0, 0], sizes = [128, 1], strides = [1, 1]} : vector<128x9xf32> to vector<128x1xf32>
    %84 = vector.broadcast %83 : vector<128x1xf32> to vector<128x128xf32>
    %85 = vector.broadcast %79 : vector<1x128xf32> to vector<128x128xf32>
    %86 = arith.subf %84, %85 : vector<128x128xf32>
    %87 = vector.extract_strided_slice %1 {offsets = [0, 1], sizes = [128, 1], strides = [1, 1]} : vector<128x9xf32> to vector<128x1xf32>
    %88 = vector.broadcast %87 : vector<128x1xf32> to vector<128x128xf32>
    %89 = vector.broadcast %80 : vector<1x128xf32> to vector<128x128xf32>
    %90 = arith.subf %88, %89 : vector<128x128xf32>
    %91 = arith.mulf %86, %86 : vector<128x128xf32>
    %92 = arith.mulf %90, %90 : vector<128x128xf32>
    %93 = arith.addf %91, %92 : vector<128x128xf32>
    %94 = math.sqrt %93 : vector<128x128xf32>
    %95 = vector.extract_strided_slice %1 {offsets = [0, 2], sizes = [128, 1], strides = [1, 1]} : vector<128x9xf32> to vector<128x1xf32>
    %96 = vector.broadcast %95 : vector<128x1xf32> to vector<128x128xf32>
    %97 = vector.broadcast %81 : vector<1x128xf32> to vector<128x128xf32>
    %98 = arith.subf %96, %97 : vector<128x128xf32>
    %99 = vector.extract_strided_slice %1 {offsets = [0, 3], sizes = [128, 1], strides = [1, 1]} : vector<128x9xf32> to vector<128x1xf32>
    %100 = vector.broadcast %99 : vector<128x1xf32> to vector<128x128xf32>
    %101 = vector.broadcast %82 : vector<1x128xf32> to vector<128x128xf32>
    %102 = arith.subf %100, %101 : vector<128x128xf32>
    %103 = arith.mulf %98, %98 : vector<128x128xf32>
    %104 = arith.mulf %102, %102 : vector<128x128xf32>
    %105 = arith.addf %103, %104 : vector<128x128xf32>
    %106 = math.sqrt %105 : vector<128x128xf32>
    %107 = arith.subf %94, %106 : vector<128x128xf32>
    %108 = math.absf %107 : vector<128x128xf32>
    %cst_11 = arith.constant 0.000000e+00 : f32
    %109 = vector.broadcast %cst_11 : f32 to vector<128x128xf32>
    %110 = arith.select %78, %108, %109 : vector<128x128xi1>, vector<128x128xf32>
    %111 = vector.shape_cast %110 : vector<128x128xf32> to vector<1x128x128xf32>
    %cst_12 = arith.constant dense<0.000000e+00> : vector<1xf32>
    %112 = vector.multi_reduction <add>, %111, %cst_12 [1, 2] : vector<1x128x128xf32> to vector<1xf32>
    %113 = vector.shape_cast %112 : vector<1xf32> to vector<1x1x1xf32>
    %114 = vector.extract %113[0, 0, 0] : f32 from vector<1x1x1xf32>
    %115 = vector.extract_strided_slice %1 {offsets = [0, 4], sizes = [128, 1], strides = [1, 1]} : vector<128x9xf32> to vector<128x1xf32>
    %116 = vector.extract_strided_slice %1 {offsets = [0, 5], sizes = [128, 1], strides = [1, 1]} : vector<128x9xf32> to vector<128x1xf32>
    %117 = vector.extract_strided_slice %1 {offsets = [0, 6], sizes = [128, 1], strides = [1, 1]} : vector<128x9xf32> to vector<128x1xf32>
    %118 = vector.extract_strided_slice %1 {offsets = [0, 7], sizes = [128, 1], strides = [1, 1]} : vector<128x9xf32> to vector<128x1xf32>
    %119 = arith.mulf %115, %115 : vector<128x1xf32>
    %120 = arith.mulf %116, %116 : vector<128x1xf32>
    %121 = arith.addf %119, %120 : vector<128x1xf32>
    %122 = math.sqrt %121 : vector<128x1xf32>
    %123 = arith.mulf %117, %117 : vector<128x1xf32>
    %124 = arith.mulf %118, %118 : vector<128x1xf32>
    %125 = arith.addf %123, %124 : vector<128x1xf32>
    %126 = math.sqrt %125 : vector<128x1xf32>
    %cst_13 = arith.constant 9.99999997E-7 : f32
    %127 = vector.broadcast %cst_13 : f32 to vector<128x1xf32>
    %128 = arith.addf %122, %127 : vector<128x1xf32>
    %129 = tpu.reciprocal %128 : vector<128x1xf32> -> vector<128x1xf32>
    %cst_14 = arith.constant 9.99999997E-7 : f32
    %130 = vector.broadcast %cst_14 : f32 to vector<128x1xf32>
    %131 = arith.addf %126, %130 : vector<128x1xf32>
    %132 = tpu.reciprocal %131 : vector<128x1xf32> -> vector<128x1xf32>
    %133 = tpu.iota {dimensions = array<i32: 1>} : vector<128x4xi32>
    %134 = vector.extract_strided_slice %1 {offsets = [0, 4], sizes = [128, 4], strides = [1, 1]} : vector<128x9xf32> to vector<128x4xf32>
    %c2_i32 = arith.constant 2 : i32
    %135 = vector.broadcast %c2_i32 : i32 to vector<128x4xi32>
    %136 = arith.cmpi slt, %133, %135 : vector<128x4xi32>
    %cst_15 = arith.constant 0.000000e+00 : f32
    %137 = vector.broadcast %cst_15 : f32 to vector<128x1xf32>
    %138 = arith.subf %137, %132 : vector<128x1xf32>
    %139 = vector.shape_cast %129 : vector<128x1xf32> to vector<128x1xf32>
    %140 = vector.broadcast %139 : vector<128x1xf32> to vector<128x4xf32>
    %141 = vector.shape_cast %138 : vector<128x1xf32> to vector<128x1xf32>
    %142 = vector.broadcast %141 : vector<128x1xf32> to vector<128x4xf32>
    %143 = arith.select %136, %140, %142 : vector<128x4xi1>, vector<128x4xf32>
    %144 = arith.mulf %134, %143 : vector<128x4xf32>
    %145 = tpu.iota {dimensions = array<i32: 0>} : vector<4x128xi32>
    %c2_i32_16 = arith.constant 2 : i32
    %146 = vector.broadcast %c2_i32_16 : i32 to vector<4x128xi32>
    %147 = arith.cmpi slt, %145, %146 : vector<4x128xi32>
    %148 = vector.shape_cast %18 : vector<1x128xf32> to vector<1x128xf32>
    %149 = vector.broadcast %148 : vector<1x128xf32> to vector<4x128xf32>
    %150 = vector.shape_cast %21 : vector<1x128xf32> to vector<1x128xf32>
    %151 = vector.broadcast %150 : vector<1x128xf32> to vector<4x128xf32>
    %152 = arith.select %147, %149, %151 : vector<4x128xi1>, vector<4x128xf32>
    %153 = vector.extract_strided_slice %3 {offsets = [0, 0], sizes = [4, 128], strides = [1, 1]} : vector<17x128xf32> to vector<4x128xf32>
    %154 = arith.mulf %153, %152 : vector<4x128xf32>
    %cst_17 = arith.constant dense<0.000000e+00> : vector<128x128xf32>
    %155 = tpu.matmul %144, %154, %cst_17 {dimension_numbers = #tpu.dot_dimension_numbers<[1], [0], [0], [1], [0, 0, 1, 1], [], []>} : vector<128x4xf32>, vector<4x128xf32>, vector<128x128xf32> -> vector<128x128xf32>
    %156 = vector.extract_strided_slice %3 {offsets = [4, 0], sizes = [4, 128], strides = [1, 1]} : vector<17x128xf32> to vector<4x128xf32>
    %157 = arith.mulf %156, %152 : vector<4x128xf32>
    %cst_18 = arith.constant dense<0.000000e+00> : vector<128x128xf32>
    %158 = tpu.matmul %144, %157, %cst_18 {dimension_numbers = #tpu.dot_dimension_numbers<[1], [0], [0], [1], [0, 0, 1, 1], [], []>} : vector<128x4xf32>, vector<4x128xf32>, vector<128x128xf32> -> vector<128x128xf32>
    %159 = math.absf %155 : vector<128x128xf32>
    %cst_19 = arith.constant 0.000000e+00 : f32
    %160 = vector.broadcast %cst_19 : f32 to vector<128x128xf32>
    %161 = arith.select %78, %159, %160 : vector<128x128xi1>, vector<128x128xf32>
    %162 = vector.shape_cast %161 : vector<128x128xf32> to vector<1x128x128xf32>
    %cst_20 = arith.constant dense<0.000000e+00> : vector<1xf32>
    %163 = vector.multi_reduction <add>, %162, %cst_20 [1, 2] : vector<1x128x128xf32> to vector<1xf32>
    %164 = vector.shape_cast %163 : vector<1xf32> to vector<1x1x1xf32>
    %165 = vector.extract %164[0, 0, 0] : f32 from vector<1x1x1xf32>
    %166 = arith.addf %114, %165 : f32
    %167 = math.absf %158 : vector<128x128xf32>
    %cst_21 = arith.constant 0.000000e+00 : f32
    %168 = vector.broadcast %cst_21 : f32 to vector<128x128xf32>
    %169 = arith.select %78, %167, %168 : vector<128x128xi1>, vector<128x128xf32>
    %170 = vector.shape_cast %169 : vector<128x128xf32> to vector<1x128x128xf32>
    %cst_22 = arith.constant dense<0.000000e+00> : vector<1xf32>
    %171 = vector.multi_reduction <add>, %170, %cst_22 [1, 2] : vector<1x128x128xf32> to vector<1xf32>
    %172 = vector.shape_cast %171 : vector<1xf32> to vector<1x1x1xf32>
    %173 = vector.extract %172[0, 0, 0] : f32 from vector<1x1x1xf32>
    %174 = arith.addf %166, %173 : f32
    %175 = tpu.iota {dimensions = array<i32: 0>} : vector<8x128xi32>
    %c0_i32 = arith.constant 0 : i32
    %176 = vector.broadcast %c0_i32 : i32 to vector<8x128xi32>
    %177 = arith.cmpi eq, %175, %176 : vector<8x128xi32>
    %c1_i32 = arith.constant 1 : i32
    %178 = vector.broadcast %c1_i32 : i32 to vector<8x128xi32>
    %179 = arith.cmpi eq, %175, %178 : vector<8x128xi32>
    %cst_23 = arith.constant 0.000000e+00 : f32
    %180 = vector.broadcast %74 : f32 to vector<8x128xf32>
    %181 = vector.broadcast %cst_23 : f32 to vector<8x128xf32>
    %182 = arith.select %179, %180, %181 : vector<8x128xi1>, vector<8x128xf32>
    %183 = vector.broadcast %174 : f32 to vector<8x128xf32>
    %184 = arith.select %177, %183, %182 : vector<8x128xi1>, vector<8x128xf32>
    %185 = vector.shape_cast %184 : vector<8x128xf32> to vector<1x1x8x128xf32>
    %c0_24 = arith.constant 0 : index
    %c0_25 = arith.constant 0 : index
    %c0_26 = arith.constant 0 : index
    %c0_27 = arith.constant 0 : index
    %186 = vector.load %arg4[%c0_24, %c0_25, %c0_26, %c0_27] : memref<1x1x8x128xf32, #tpu.memory_space<vmem>>, vector<1x1x8x128xf32>
    tpu.vector_store %arg4[%c0_24, %c0_25, %c0_26, %c0_27], %185 {strides = array<i32>} : memref<1x1x8x128xf32, #tpu.memory_space<vmem>>, vector<1x1x8x128xf32>,
    return
  }
  func.func @transform_0(%arg0: i32, %arg1: i32) -> (i32, i32, i32) {
    %c0_i32 = arith.constant 0 : i32
    %c0_i32_0 = arith.constant 0 : i32
    return %arg0, %arg1, %c0_i32 : i32, i32, i32
  }
  func.func @transform_1(%arg0: i32, %arg1: i32) -> (i32, i32, i32) {
    %c0_i32 = arith.constant 0 : i32
    %c0_i32_0 = arith.constant 0 : i32
    %c0_i32_1 = arith.constant 0 : i32
    return %arg0, %c0_i32, %c0_i32_0 : i32, i32, i32
  }
  func.func @transform_2(%arg0: i32, %arg1: i32) -> (i32, i32, i32, i32) {
    %c0_i32 = arith.constant 0 : i32
    %c0_i32_0 = arith.constant 0 : i32
    %c0_i32_1 = arith.constant 0 : i32
    return %arg0, %arg1, %c0_i32, %c0_i32_0 : i32, i32, i32, i32
  }
}

</mosaic_0001>

<bundles_post_ra>
// kernel: tpu_custom_call.1
= control target key start
LH: loop header
LB: loop body
LE: loop exit
PB: predicated region body
PF: predicated region fallthrough
CT: control target
= control target key end

     0   :  { %7 = vsyncpa [#allocation3], 0  ;;  %s4029_s0 = inlined_call_operand.vmem [shape: f32[2,128,9], index: 0, kind: input, shape index: {}]   ;;  %s4030_s1 = inlined_call_operand.vmem [shape: f32[2,17,128], index: 1, kind: input, shape index: {}]   ;;  %s4031_s2 = inlined_call_operand.hbm [shape: f32[2,1,8,128], index: 2, kind: output, shape index: {}]  }
   0x1   :  { %9 = vsyncpa [#allocation3 + $0x1], 0  ;;  %s2773_s9 = smov 0   ;;  %s2775_s10 = smov 0  }
   0x2   :  { %s2777_s11 = smov 0   ;;  %s2779_s12 = smov 0  }
   0x3   :  { %s2781_s13 = smov 0   ;;  %s2783_s14 = smov 0  }
   0x4 LB: > { %s2254_s15 = sadd.s32 4294967295, %s2745_s14   ;;  %s2255_s16 = sadd.s32 4294967294, %s2745_s14   ;;  %s2745_s14 = sphi %s2783_s14, %s15_s14   ;;  %s2741_s13 = sphi %s2781_s13, %s4050_s13   ;;  %s2737_s12 = sphi %s2779_s12, %s4049_s12   ;;  %s2733_s11 = sphi %s2777_s11, %s4048_s11   ;;  %s2729_s10 = sphi %s2775_s10, %s4047_s10   ;;  %s2725_s9 = sphi %s2773_s9, %s4046_s9  }
   0x5   : > { %s27_s17 = sadd.s32 1, %s2741_s13  ;;  %s90_s18 = sadd.s32 1, %s2733_s11 }
   0x6   : > { %p29_p0 = scmp.ge.s32.totalorder %s27_s17, 2  ;;  %p100_p1 = scmp.ne.s32.totalorder %s2733_s11, %s2729_s10 }
   0x7   : > { %p101_p2 = scmp.eq.s32.totalorder %s2254_s15, 1  ;;  %p106_p3 = scmp.ne.s32.totalorder %s2729_s10, %s2725_s9 }
   0x8   : > { %s4052_s17 = smov (%p29_p0, %s27_s17), 0  ;;  %p107_p5 = scmp.eq.s32.totalorder %s2255_s16, 1 }
   0x9   : > { %p2813_p4 = por %p101_p2, %p100_p1  ;;  %s85_s20 = ssub.s32 %s2741_s13, %s4052_s17 }
   0xa   : > { %p2258_p6 = scmp.ge.s32.totalorder %s2745_s14, 1  ;;  %p88_p7 = scmp.eq.s32.totalorder %s85_s20, 0 }
   0xb   : > { %p2820_p8 = por %p107_p5, %p106_p3  ;;  %p146_p9 = scmp.lt.s32.totalorder %s2745_s14, 3 }
   0xc   : > { %s2826_s22 = scalar_select %p88_p7, %s2733_s11, %s90_s18  }
   0xd   : > { %p147_p10 = pnand %p2258_p6, %p146_p9 }
   0xe   : > { %p178_p11 = scmp.lt.s32.totalorder (!%p147_p10), %s2737_s12, 1  ;;  %s2747_s29 = smov (!%p147_p10), 127   ;;  %v2748_v37 = vmov (!%p147_p10), 4   ;;  %vm282_vm5 = vcmask (!%p147_p10), 1040384  }
   0xf   : > { %150 = sbr.rel (%p147_p10) target bundleno = 1135 (0x46f), region = 28  ;;  %2462 = vset.pattern.permute.xlu1 (!%p147_p10), %v2748_v37  ;;  %2463 = vset.pattern.permute.xlu0 (!%p147_p10), %v2748_v37  ;;  %s2750_s5 = smov (!%p147_p10), 4  }
  0x10   : > { %s2752_s6 = smov (!%p147_p10), 124   ;;  %s174_s7 = sand.u32 (!%p147_p10), 1, %s2729_s10  }
  0x11   : > { %s2259_s8 = sshll.u32 (!%p147_p10), %s174_s7, 3 }
  0x12   : > { %s176_s25 = scalar_lea.vmem (!%p147_p10), [#allocation2], %s2259_s8 }
  0x13   : > { %s2168_s26 = sshll.u32 (!%p147_p10), %s176_s25, 4  ;;  %s3984_s26 = int_to_ptr.vmem [resolvable:$true] %s2168_s26 }
  0x14   : > { %s2667_s3 = scalar_lea.vmem (!%p147_p10), %s3984_s26, 128 }
  0x15   : > { %p2668_p12 = scmp.ne.s32.totalorder (!%p147_p10), %s3984_s26, %s2667_s3 }
  0x16   : > { %s179_s23 = scalar_select %p178_p11, %s2737_s12, 1 }
  0x17   : > { %p2669_p13 = pnand %p2668_p12, %p2813_p4 }
  0x18   : > { %s2301_s24 = sshll.u32 %s179_s23, 7  ;;  %s2388_s28 = smul.u32 24, %s179_s23 }
  0x19   : > { %s2833_s27 = scalar_lea.vmem %s4029_s0, %s2301_s24  ;;  %s2298_s23 = sshll.u32 %s2737_s12, 7 }
  0x1a   : > { %v2836_v0 = vld [vmem:[%s2833_s27 + $0x10] sm:$0xff]  ;;  %v2839_v1 = vld [vmem:[%s2833_s27] sm:$0xff]  ;;  %v2842_v2 = vld [vmem:[%s2833_s27 + $0x18] sm:$0xff]  ;;  %s2870_s4 = scalar_lea.vmem %s4030_s1, %s2388_s28  ;;  %s3982_s30 = scalar_lea.hbm %s4031_s2, %s2298_s23 }
  0x1b   : > { %v2846_v3 = vmul.f32 %v2836_v0, %v2836_v0  ;;  %v2850_v4 = vmul.f32 %v2839_v1, %v2839_v1  ;;  %v2853_v5 = vld [vmem:[%s2833_s27 + $0x8] sm:$0xff]  ;;  %v2861_v6 = vmul.f32 %v2842_v2, %v2842_v2  ;;  %v2876_v9 = vld [vmem:[%s2833_s27 + $0x20] sm:$0xff]  ;;  %v2901_v16 = vld [vmem:[%s2833_s27 + $0x38] sm:$0xff]  ;;  %s2154_s12 = scalar_lea.sflag [#allocation3], %s174_s7  ;;  %p2670_p0 = pneg %p2669_p13 }
  0x1c   : > { %v2865_v7 = vmul.f32 %v2853_v5, %v2853_v5  ;;  %v2873_v8 = vld [vmem:[%s2833_s27 + $0x28] sm:$0xff]  ;;  %v2879_v10 = vld [vmem:[%s2870_s4] sm:$0xff]  ;;  %v2896_v14 = vmul.f32 %v2876_v9, %v2876_v9  ;;  %v2904_v17 = vld [vmem:[%s2833_s27 + $0x30] sm:$0xff]  ;;  %v2912_v21 = vmul.f32 %v2901_v16, %v2901_v16 }
  0x1d   : > { %1157 = vrot.lane.b32.xlu1 %v2846_v3, %s2747_s29  ;;  %1153 = vrot.lane.b32.xlu0 %v2850_v4, %s2747_s29  ;;  %v2882_v11 = vld [vmem:[%s2870_s4 + $0x8] sm:$0xff]  ;;  %v211_v12 = vmul.f32 %v2879_v10, %v2879_v10  ;;  %v2892_v13 = vmul.f32 %v2873_v8, %v2873_v8  ;;  %v2916_v22 = vmul.f32 %v2904_v17, %v2904_v17  ;;  %v2919_v24 = vld [vmem:[%s2833_s27 + $0x40] sm:$0xff] }
  0x1e   : > { %v225_v15 = vmul.f32 %v2882_v11, %v2882_v11  ;;  %v2922_v25 = vld [vmem:[%s2833_s27 + $0x48] sm:$0xff]  ;;  %v2930_v26 = vmul.f32 %v2919_v24, %v2919_v24  ;;  %v2937_v28 = vld [vmem:[%s2833_s27 + $0x50] sm:$0xff]  ;;  %v2940_v29 = vld [vmem:[%s2833_s27 + $0x58] sm:$0xff]  ;;  %v244_v52 = vrot.slane %v2882_v11, 4  ;;  %v255_v53 = vrot.slane %v2882_v11, 3 }
  0x1f   : > { %v213_v18 = vrot.slane %v211_v12, 1  ;;  %v2934_v27 = vmul.f32 %v2922_v25, %v2922_v25  ;;  %v2948_v30 = vmul.f32 %v2937_v28, %v2937_v28  ;;  %v2952_v31 = vmul.f32 %v2940_v29, %v2940_v29  ;;  %v2955_v32 = vld [vmem:[%s2833_s27 + $0x60] sm:$0xff]  ;;  %v2958_v33 = vld [vmem:[%s2833_s27 + $0x68] sm:$0xff]  ;;  %v2973_v39 = vld [vmem:[%s2833_s27 + $0x70] sm:$0xff] }
  0x20   : > { %v227_v19 = vrot.slane %v225_v15, 1  ;;  %v2962_v35 = vmul.f32 %v2955_v32, %v2955_v32  ;;  %v2966_v36 = vmul.f32 %v2958_v33, %v2958_v33  ;;  %v2976_v43 = vld [vmem:[%s2833_s27 + $0x78] sm:$0xff]  ;;  %v2981_v46 = vmul.f32 %v2973_v39, %v2973_v39 }
  0x21   : > { %1159 = vrot.lane.b32.xlu1 %v2861_v6, %s2747_s29  ;;  %1155 = vrot.lane.b32.xlu0 %v2865_v7, %s2747_s29  ;;  %v215_v20 = vadd.f32 %v213_v18, %v211_v12  ;;  %v2989_v48 = vmul.f32 %v2976_v43, %v2976_v43  ;;  %v246_v56 = vmul.f32 %v244_v52, %v2879_v10  ;;  %v252_v57 = vrot.slane %v2882_v11, 5 }
  0x22   : > { %v229_v23 = vadd.f32 %v227_v19, %v225_v15  ;;  %v257_v58 = vmul.f32 %v255_v53, %v2879_v10 }
  0x23   : > { %2512 = vrsqrt.f32 %v215_v20  ;;  %vm218_vm0 = vcmp.eq.f32.partialorder %v215_v20, inf  ;;  %v221_v41 = vand.u32 2147483648, %v215_v20  ;;  %vm220_vm2 = vcmp.eq.f32.partialorder %v215_v20, 0.0 }
  0x24   : > { %2514 = vrsqrt.f32 %v229_v23  ;;  %vm232_vm1 = vcmp.eq.f32.partialorder %v229_v23, inf  ;;  %v235_v42 = vand.u32 2147483648, %v229_v23  ;;  %vm234_vm3 = vcmp.eq.f32.partialorder %v229_v23, 0.0 }
  0x25   : > { %1163 = vrot.lane.b32.xlu1 %v2892_v13, %s2747_s29  ;;  %1161 = vrot.lane.b32.xlu0 %v2896_v14, %s2747_s29  ;;  %v248_v59 = vrot.slane %v246_v56, 1  ;;  %v254_v60 = vmul.f32 %v252_v57, %v2879_v10  ;;  %v259_v61 = vrot.slane %v257_v58, 1 }
  0x27   : > { %v250_v62 = vadd.f32 %v248_v59, %v246_v56  ;;  %v261_v63 = vsub.f32 %v254_v60, %v259_v61 }
  0x29   : > { %1167 = vrot.lane.b32.xlu1 %v2912_v21, %s2747_s29  ;;  %1165 = vrot.lane.b32.xlu0 %v2916_v22, %s2747_s29 }
  0x2d   : > { %1169 = vrot.lane.b32.xlu0 %v2930_v26, %s2747_s29  ;;  %1171 = vrot.lane.b32.xlu1 %v2934_v27, %s2747_s29  ;;  %v2513_v34 = vpop.eup %2512 }
  0x2e   : > { %v2515_v38 = vpop.eup %2514  ;;  %v217_v40 = vmul.f32 %v2513_v34, %v215_v20 }
  0x2f   : > { %v231_v44 = vmul.f32 %v2515_v38, %v229_v23 }
  0x30   : > { %v219_v45 = vsel %vm218_vm0, %v215_v20, %v217_v40  ;;  %v210_v40 = vld [vmem:[%s2870_s4 + $0x10] sm:$0x1] }
  0x31   : > { %1173 = vrot.lane.b32.xlu0 %v2948_v30, %s2747_s29  ;;  %1175 = vrot.lane.b32.xlu1 %v2952_v31, %s2747_s29  ;;  %v233_v47 = vsel %vm232_vm1, %v229_v23, %v231_v44  ;;  %v2991_v49 = vsel %vm220_vm2, %v221_v41, %v219_v45  ;;  %vm280_vm4 = vcmp.ge.f32.partialorder %v210_v40, 0.0 }
  0x32   : > { %v236_v50 = vsel %vm234_vm3, %v235_v42, %v233_v47  ;;  %v264_v12 = vrot.slane %v2991_v49, 2 }
  0x33   : > { %v238_v51 = vrot.slane %v236_v50, 4 }
  0x34   : > { %v266_v20 = vsub.f32 %v2991_v49, %v264_v12 }
  0x35   : > { %1177 = vrot.lane.b32.xlu0 %v2962_v35, %s2747_s29  ;;  %1179 = vrot.lane.b32.xlu1 %v2966_v36, %s2747_s29  ;;  %v240_v54 = vmul.f32 %v238_v51, %v2991_v49 }
  0x36   : > { %v267_v11 = vand.u32 2147483647, %v266_v20 }
  0x37   : > { %v241_v55 = vadd.f32 1e-06, %v240_v54 }
  0x39   : > { %1181 = vrot.lane.b32.xlu0 %v2981_v46, %s2747_s29  ;;  %1183 = vrot.lane.b32.xlu1 %v2989_v48, %s2747_s29  ;;  %2516 = vrcp.f32 %v241_v55 }
  0x43   : > { %v2517_v15 = vpop.eup %2516 }
  0x44   : > { %v251_v18 = vmul.f32 %v2517_v15, %v250_v62  ;;  %v262_v19 = vmul.f32 %v2517_v15, %v261_v63 }
  0x46   : > { %v269_v23 = vrot.slane %v251_v18, 2  ;;  %v275_v34 = vrot.slane %v262_v19, 2 }
  0x48   : > { %v271_v37 = vsub.f32 %v251_v18, %v269_v23  ;;  %v277_v38 = vsub.f32 %v262_v19, %v275_v34 }
  0x4a   : > { %v272_v41 = vand.u32 2147483647, %v271_v37  ;;  %v278_v42 = vand.u32 2147483647, %v277_v38 }
  0x4c   : > { %v273_v44 = vadd.f32 %v272_v41, %v267_v11 }
  0x4e   : > { %v279_v45 = vadd.f32 %v278_v42, %v273_v44 }
  0x50   : > { %v281_v47 = vsel %vm280_vm4, %v279_v45, 0.0 }
  0x51   : > { %v283_v50 = vsel %vm282_vm5, %v281_v47, 0.0 }
  0x58   : > { %284 = vadd.xlane.f32.xlu0 %v283_v50 }
  0x8f   : > { %v1158_v51 = vpop.permute.xlu1 %1157  ;;  %v1154_v52 = vpop.permute.xlu0 %1153 }
  0x90   : > { %v1203_v53 = vadd.f32 %v1158_v51, %v2846_v3  ;;  %v1201_v54 = vadd.f32 %v1154_v52, %v2850_v4 }
  0x92   : > { %2518 = vrsqrt.f32 %v1203_v53  ;;  %vm1219_vm6 = vcmp.eq.f32.partialorder %v1201_v54, inf  ;;  %vm1233_vm7 = vcmp.eq.f32.partialorder %v1203_v53, inf  ;;  %vm1221_vm8 = vcmp.eq.f32.partialorder %v1201_v54, 0.0 }
  0x93   : > { %2520 = vrsqrt.f32 %v1201_v54  ;;  %v1160_v55 = vpop.permute.xlu1 %1159  ;;  %v1156_v56 = vpop.permute.xlu0 %1155  ;;  %vm1235_vm9 = vcmp.eq.f32.partialorder %v1203_v53, 0.0  ;;  %v1236_v37 = vand.u32 2147483648, %v1203_v53 }
  0x94   : > { %v3010_v57 = vadd.f32 %v1160_v55, %v2861_v6  ;;  %v1202_v58 = vadd.f32 %v1156_v56, %v2865_v7 }
  0x96   : > { %2522 = vrsqrt.f32 %v3010_v57  ;;  %vm1240_vm10 = vcmp.eq.f32.partialorder %v3010_v57, inf  ;;  %vm1226_vm11 = vcmp.eq.f32.partialorder %v1202_v58, inf  ;;  %v1229_v42 = vand.u32 2147483648, %v1202_v58 }
  0x97   : > { %2524 = vrsqrt.f32 %v1202_v58  ;;  %v1164_v59 = vpop.permute.xlu1 %1163  ;;  %v1162_v60 = vpop.permute.xlu0 %1161  ;;  %vm1228_vm12 = vcmp.eq.f32.partialorder %v1202_v58, 0.0  ;;  %vm1242_vm13 = vcmp.eq.f32.partialorder %v3010_v57, 0.0  ;;  %v1243_v52 = vand.u32 2147483648, %v3010_v57 }
  0x98   : > { %v3015_v61 = vadd.f32 %v1164_v59, %v2892_v13  ;;  %v3018_v3 = vadd.f32 %v1162_v60, %v2896_v14  ;;  %v1222_v14 = vand.u32 2147483648, %v1201_v54 }
  0x9a   : > { %2526 = vrsqrt.f32 %v3015_v61  ;;  %vm1247_vm14 = vcmp.eq.f32.partialorder %v3018_v3, inf  ;;  %vm1249_vm15 = vcmp.eq.f32.partialorder %v3018_v3, 0.0  ;;  %vm1254_vm0 = vcmp.eq.f32.partialorder %v3015_v61, inf }
  0x9b   : > { %2528 = vrsqrt.f32 %v3018_v3  ;;  %v1168_v4 = vpop.permute.xlu1 %1167  ;;  %v1166_v6 = vpop.permute.xlu0 %1165  ;;  %vm1256_vm1 = vcmp.eq.f32.partialorder %v3015_v61, 0.0 }
  0x9c   : > { %v2519_v62 = vpop.eup %2518  ;;  %v3023_v7 = vadd.f32 %v1168_v4, %v2912_v21  ;;  %v3026_v63 = vadd.f32 %v1166_v6, %v2916_v22 }
  0x9d   : > { %v2521_v12 = vpop.eup %2520  ;;  %v1232_v15 = vmul.f32 %v2519_v62, %v1203_v53 }
  0x9e   : > { %v1218_v13 = vmul.f32 %v2521_v12, %v1201_v54  ;;  %2530 = vrsqrt.f32 %v3023_v7  ;;  %vm1268_vm2 = vcmp.eq.f32.partialorder %v3023_v7, inf  ;;  %vm1261_vm3 = vcmp.eq.f32.partialorder %v3026_v63, inf }
  0x9f   : > { %2532 = vrsqrt.f32 %v3026_v63  ;;  %v1170_v18 = vpop.permute.xlu0 %1169  ;;  %v1172_v23 = vpop.permute.xlu1 %1171  ;;  %v1234_v34 = vsel %vm1233_vm7, %v1203_v53, %v1232_v15  ;;  %vm1270_vm4 = vcmp.eq.f32.partialorder %v3023_v7, 0.0  ;;  %vm1263_vm5 = vcmp.eq.f32.partialorder %v3026_v63, 0.0 }
  0xa0   : > { %v2523_v19 = vpop.eup %2522  ;;  %v1220_v20 = vsel %vm1219_vm6, %v1201_v54, %v1218_v13  ;;  %v3031_v11 = vadd.f32 %v1170_v18, %v2930_v26  ;;  %v3036_v44 = vadd.f32 %v1172_v23, %v2934_v27  ;;  %v1237_v47 = vsel %vm1235_vm9, %v1236_v37, %v1234_v34 }
  0xa1   : > { %v2525_v21 = vpop.eup %2524  ;;  %v1223_v22 = vsel %vm1221_vm8, %v1222_v14, %v1220_v20  ;;  %v1239_v40 = vmul.f32 %v2523_v19, %v3010_v57  ;;  %v1331_v60 = vadd.f32 1e-06, %v1237_v47 }
  0xa2   : > { %v1329_v38 = vadd.f32 1e-06, %v1223_v22  ;;  %v1225_v41 = vmul.f32 %v2525_v21, %v1202_v58  ;;  %vm1275_vm6 = vcmp.eq.f32.partialorder %v3031_v11, inf  ;;  %vm1277_vm7 = vcmp.eq.f32.partialorder %v3031_v11, 0.0 }
  0xa3   : > { %v1174_v51 = vpop.permute.xlu0 %1173  ;;  %v1241_v54 = vsel %vm1240_vm10, %v3010_v57, %v1239_v40  ;;  %v1176_v59 = vpop.permute.xlu1 %1175  ;;  %v1257_v57 = vand.u32 2147483648, %v3015_v61  ;;  %vm1282_vm8 = vcmp.eq.f32.partialorder %v3036_v44, inf }
  0xa4   : > { %v2527_v45 = vpop.eup %2526  ;;  %2534 = vrcp.f32 %v1329_v38  ;;  %v1227_v50 = vsel %vm1226_vm11, %v1202_v58, %v1225_v41  ;;  %v1250_v58 = vand.u32 2147483648, %v3018_v3  ;;  %v3050_v62 = vadd.f32 %v1174_v51, %v2948_v30 }
  0xa5   : > { %v2529_v26 = vpop.eup %2528  ;;  %v1230_v53 = vsel %vm1228_vm12, %v1229_v42, %v1227_v50  ;;  %2536 = vrsqrt.f32 %v3031_v11  ;;  %v1253_v27 = vmul.f32 %v2527_v45, %v3015_v61  ;;  %v1244_v13 = vsel %vm1242_vm13, %v1243_v52, %v1241_v54 }
  0xa6   : > { %v1330_v55 = vadd.f32 1e-06, %v1230_v53  ;;  %v1246_v56 = vmul.f32 %v2529_v26, %v3018_v3  ;;  %2538 = vrsqrt.f32 %v3036_v44  ;;  %v3056_v18 = vadd.f32 %v1176_v59, %v2952_v31 }
  0xa7   : > { %v1178_v12 = vpop.permute.xlu0 %1177  ;;  %v1255_v19 = vsel %vm1254_vm0, %v3015_v61, %v1253_v27  ;;  %v1180_v30 = vpop.permute.xlu1 %1179  ;;  %v1332_v21 = vadd.f32 1e-06, %v1244_v13  ;;  %v1271_v38 = vand.u32 2147483648, %v3023_v7  ;;  %v1264_v61 = vand.u32 2147483648, %v3026_v63 }
  0xa8   : > { %v2531_v4 = vpop.eup %2530  ;;  %2540 = vrcp.f32 %v1330_v55  ;;  %v1248_v6 = vsel %vm1247_vm14, %v3018_v3, %v1246_v56  ;;  %v1258_v34 = vsel %vm1256_vm1, %v1257_v57, %v1255_v19  ;;  %v3073_v40 = vadd.f32 %v1178_v12, %v2962_v35 }
  0xa9   : > { %v2533_v15 = vpop.eup %2532  ;;  %v1251_v14 = vsel %vm1249_vm15, %v1250_v58, %v1248_v6  ;;  %2542 = vrsqrt.f32 %v3050_v62  ;;  %v1267_v3 = vmul.f32 %v2531_v4, %v3023_v7  ;;  %v3076_v41 = vadd.f32 %v1180_v30, %v2966_v36 }
  0xaa   : > { %v1333_v20 = vadd.f32 1e-06, %v1251_v14  ;;  %v1260_v23 = vmul.f32 %v2533_v15, %v3026_v63  ;;  %2544 = vrcp.f32 %v1331_v60  ;;  %v1334_v51 = vadd.f32 1e-06, %v1258_v34 }
  0xab   : > { %v1182_v31 = vpop.permute.xlu0 %1181  ;;  %v1184_v42 = vpop.permute.xlu1 %1183  ;;  %v1269_v47 = vsel %vm1268_vm2, %v3023_v7, %v1267_v3  ;;  %vm1289_vm9 = vcmp.eq.f32.partialorder %v3050_v62, inf  ;;  %vm1291_vm10 = vcmp.eq.f32.partialorder %v3050_v62, 0.0  ;;  %v1292_v55 = vand.u32 2147483648, %v3050_v62 }
  0xac   : > { %2546 = vrcp.f32 %v1333_v20  ;;  %v1262_v22 = vsel %vm1261_vm3, %v3026_v63, %v1260_v23  ;;  %v3083_v50 = vadd.f32 %v1182_v31, %v2981_v46  ;;  %v3089_v52 = vadd.f32 %v1184_v42, %v2989_v48 }
  0xad   : > { %2548 = vrsqrt.f32 %v3056_v18  ;;  %v1265_v35 = vsel %vm1263_vm5, %v1264_v61, %v1262_v22  ;;  %v1272_v63 = vsel %vm1270_vm4, %v1271_v38, %v1269_v47  ;;  %v1278_v46 = vand.u32 2147483648, %v3031_v11 }
  0xae   : > { %v3068_v37 = vpop.eup %2534  ;;  %2550 = vrcp.f32 %v1332_v21  ;;  %v1335_v53 = vadd.f32 1e-06, %v1265_v35  ;;  %v1336_v56 = vadd.f32 1e-06, %v1272_v63  ;;  %vm1284_vm11 = vcmp.eq.f32.partialorder %v3036_v44, 0.0 }
  0xaf   : > { %v2537_v45 = vpop.eup %2536  ;;  %1382 = vperm.xlu1 %2462, %v3068_v37   ;;  %2552 = vrsqrt.f32 %v3073_v40  ;;  %v1285_v4 = vand.u32 2147483648, %v3036_v44  ;;  %vm1296_vm12 = vcmp.eq.f32.partialorder %v3056_v18, inf  ;;  %vm1298_vm13 = vcmp.eq.f32.partialorder %v3056_v18, 0.0 }
  0xb0   : > { %v2539_v26 = vpop.eup %2538  ;;  %v1274_v36 = vmul.f32 %v2537_v45, %v3031_v11  ;;  %2554 = vrsqrt.f32 %v3076_v41  ;;  %v1299_v15 = vand.u32 2147483648, %v3056_v18  ;;  %vm1303_vm14 = vcmp.eq.f32.partialorder %v3073_v40, inf }
  0xb1   : > { %2556 = vrsqrt.f32 %v3083_v50  ;;  %v1281_v54 = vmul.f32 %v2539_v26, %v3036_v44  ;;  %vm1305_vm15 = vcmp.eq.f32.partialorder %v3073_v40, 0.0  ;;  %v1306_v57 = vand.u32 2147483648, %v3073_v40 }
  0xb2   : > { %v3091_v7 = vpop.eup %2540  ;;  %2558 = vrcp.f32 %v1334_v51  ;;  %v1276_v59 = vsel %vm1275_vm6, %v3031_v11, %v1274_v36  ;;  %vm1310_vm0 = vcmp.eq.f32.partialorder %v3076_v41, inf  ;;  %vm1312_vm1 = vcmp.eq.f32.partialorder %v3076_v41, 0.0 }
  0xb3   : > { %1387 = vperm.xlu1 %2462, %v3091_v7   ;;  %v2543_v48 = vpop.eup %2542  ;;  %2560 = vrsqrt.f32 %v3089_v52  ;;  %v1279_v13 = vsel %vm1277_vm7, %v1278_v46, %v1276_v59  ;;  %v1283_v14 = vsel %vm1282_vm8, %v3036_v44, %v1281_v54  ;;  %v1313_v61 = vand.u32 2147483648, %v3076_v41 }
  0xb4   : > { %v3103_v27 = vpop.eup %2544  ;;  %v1288_v60 = vmul.f32 %v2543_v48, %v3050_v62  ;;  %2562 = vrcp.f32 %v1335_v53  ;;  %v1337_v3 = vadd.f32 1e-06, %v1279_v13  ;;  %v1286_v21 = vsel %vm1284_vm11, %v1285_v4, %v1283_v14 }
  0xb5   : > { %2564 = vrcp.f32 %v1336_v56  ;;  %vm1317_vm2 = vcmp.eq.f32.partialorder %v3083_v50, inf  ;;  %vm1319_vm3 = vcmp.eq.f32.partialorder %v3083_v50, 0.0  ;;  %v1320_v44 = vand.u32 2147483648, %v3083_v50 }
  0xb6   : > { %v3110_v58 = vpop.eup %2546  ;;  %v1290_v12 = vsel %vm1289_vm9, %v3050_v62, %v1288_v60  ;;  %vm1324_vm4 = vcmp.eq.f32.partialorder %v3089_v52, inf  ;;  %v1327_v59 = vand.u32 2147483648, %v3089_v52  ;;  %vm1326_vm5 = vcmp.eq.f32.partialorder %v3089_v52, 0.0 }
  0xb7   : > { %v2549_v6 = vpop.eup %2548  ;;  %1392 = vperm.xlu1 %2462, %v3103_v27   ;;  %1402 = vperm.xlu0 %2463, %v3110_v58   ;;  %v1293_v19 = vsel %vm1291_vm10, %v1292_v55, %v1290_v12  ;;  %vm1730_vm8 = vcmask 1043456   ;;  %vm1697_vm9 = vcmask 31744  }
  0xb8   : > { %v1295_v20 = vmul.f32 %v2549_v6, %v3056_v18  ;;  %v1339_v23 = vadd.f32 1e-06, %v1293_v19  ;;  %v3131_v30 = vpop.eup %2550 }
  0xb9   : > { %v2553_v62 = vpop.eup %2552 }
  0xba   : > { %v1297_v11 = vsel %vm1296_vm12, %v3056_v18, %v1295_v20  ;;  %2566 = vrcp.f32 %v1339_v23  ;;  %v2555_v34 = vpop.eup %2554  ;;  %v1302_v38 = vmul.f32 %v2553_v62, %v3073_v40  ;;  %v1338_v18 = vadd.f32 1e-06, %v1286_v21 }
  0xbb   : > { %1397 = vperm.xlu1 %2462, %v3131_v30   ;;  %v1300_v31 = vsel %vm1298_vm13, %v1299_v15, %v1297_v11  ;;  %v2557_v42 = vpop.eup %2556  ;;  %v1309_v45 = vmul.f32 %v2555_v34, %v3076_v41  ;;  %v2749_v11 = vmov 6   ;;  %v1367_v21 = vsub.f32 0.0, %v3131_v30 }
  0xbc   : > { %v1340_v22 = vadd.f32 1e-06, %v1300_v31  ;;  %v2559_v47 = vpop.eup %2558  ;;  %v1304_v51 = vsel %vm1303_vm14, %v3073_v40, %v1302_v38  ;;  %v1316_v35 = vmul.f32 %v2557_v42, %v3083_v50 }
  0xbd   : > { %v2561_v26 = vpop.eup %2560  ;;  %v1307_v36 = vsel %vm1305_vm15, %v1306_v57, %v1304_v51  ;;  %v1311_v63 = vsel %vm1310_vm0, %v3076_v41, %v1309_v45  ;;  %v1365_v57 = vsub.f32 0.0, %v3091_v7  ;;  %v1369_v31 = vsub.f32 0.0, %v2559_v47 }
  0xbe   : > { %2568 = vrcp.f32 %v1340_v22  ;;  %v1341_v46 = vadd.f32 1e-06, %v1307_v36  ;;  %v1314_v53 = vsel %vm1312_vm1, %v1313_v61, %v1311_v63  ;;  %v1318_v48 = vsel %vm1317_vm2, %v3083_v50, %v1316_v35  ;;  %v2563_v55 = vpop.eup %2562 }
  0xbf   : > { %2570 = vrcp.f32 %v1337_v3  ;;  %1407 = vperm.xlu1 %2462, %v2559_v47   ;;  %v1323_v54 = vmul.f32 %v2561_v26, %v3089_v52  ;;  %v1342_v56 = vadd.f32 1e-06, %v1314_v53  ;;  %v1321_v40 = vsel %vm1319_vm3, %v1320_v44, %v1318_v48  ;;  %v2565_v60 = vpop.eup %2564 }
  0xc0   : > { %2572 = vrcp.f32 %v1341_v46  ;;  %v1343_v6 = vadd.f32 1e-06, %v1321_v40  ;;  %v1366_v3 = vsub.f32 0.0, %v3103_v27  ;;  %v1370_v34 = vsub.f32 0.0, %v2563_v55 }
  0xc1   : > { %v1325_v4 = vsel %vm1324_vm4, %v3089_v52, %v1323_v54  ;;  %2574 = vrcp.f32 %v1338_v18  ;;  %v1364_v52 = vsub.f32 0.0, %v3068_v37  ;;  %v1368_v37 = vsub.f32 0.0, %v3110_v58 }
  0xc2   : > { %2576 = vrcp.f32 %v1342_v56  ;;  %v1328_v12 = vsel %vm1326_vm5, %v1327_v59, %v1325_v4  ;;  %v1371_v7 = vsub.f32 0.0, %v2565_v60  ;;  %v373_v40 = vlaneseq }
  0xc3   : > { %1412 = vperm.xlu1 %2462, %v2563_v55   ;;  %2578 = vrcp.f32 %v1343_v6  ;;  %v1344_v50 = vadd.f32 1e-06, %v1328_v12 }
  0xc4   : > { %v2567_v41 = vpop.eup %2566 }
  0xc5   : > { %1432 = vperm.xlu0 %2463, %v2567_v41   ;;  %2580 = vrcp.f32 %v1344_v50  ;;  %v1374_v18 = vsub.f32 0.0, %v2567_v41 }
  0xc7   : > { %1417 = vperm.xlu1 %2462, %v2565_v60   ;;  %v1362_v60 = vand.u32 127, %v373_v40 }
  0xc8   : > { %v2569_v15 = vpop.eup %2568 }
  0xc9   : > { %v2571_v13 = vpop.eup %2570  ;;  %1437 = vperm.xlu0 %2463, %v2569_v15   ;;  %v1375_v58 = vsub.f32 0.0, %v2569_v15  ;;  %vm1363_vm6 = vcmp.lt.s32.totalorder %v1362_v60, 2 }
  0xca   : > { %v2573_v14 = vpop.eup %2572  ;;  %v1372_v42 = vsub.f32 0.0, %v2571_v13 }
  0xcb   : > { %1422 = vperm.xlu1 %2462, %v2571_v13   ;;  %v2575_v19 = vpop.eup %2574  ;;  %v1376_v47 = vsub.f32 0.0, %v2573_v14 }
  0xcc   : > { %v2577_v20 = vpop.eup %2576  ;;  %v1373_v45 = vsub.f32 0.0, %v2575_v19 }
  0xcd   : > { %1442 = vperm.xlu0 %2463, %v2573_v14   ;;  %v2579_v23 = vpop.eup %2578  ;;  %v1377_v35 = vsub.f32 0.0, %v2577_v20 }
  0xce   : > { %v1378_v26 = vsub.f32 0.0, %v2579_v23 }
  0xcf   : > { %1427 = vperm.xlu1 %2462, %v2575_v19   ;;  %v2581_v62 = vpop.eup %2580 }
  0xd0   : > { %v1379_v36 = vsub.f32 0.0, %v2581_v62 }
  0xd1   : > { %1447 = vperm.xlu0 %2463, %v2577_v20  }
  0xd3   : > { %2464 = vset.pattern.permute.xlu1 %v2749_v11 }
  0xd4   : > { %1462 = vperm.xlu1 %2464, %v1364_v52  }
  0xd5   : > { %1452 = vperm.xlu0 %2463, %v2579_v23  }
  0xd8   : > { %1467 = vperm.xlu1 %2464, %v1365_v57  }
  0xd9   : > { %1457 = vperm.xlu0 %2463, %v2581_v62  }
  0xdc   : > { %1472 = vperm.xlu1 %2464, %v1366_v3  }
  0xe0   : > { %1477 = vperm.xlu1 %2464, %v1367_v21  }
  0xe4   : > { %1482 = vperm.xlu1 %2464, %v1368_v37  }
  0xe5   : > { %v285_v22 = vpop.xlane.xlu0 %284 }
  0xe6   : > { %v286_v38 = vrot.slane %v285_v22, 4 }
  0xe8   : > { %1487 = vperm.xlu1 %2464, %v1369_v31   ;;  %v287_v61 = vadd.f32 %v286_v38, %v285_v22 }
  0xea   : > { %v288_v27 = vrot.slane %v287_v61, 2 }
  0xec   : > { %1492 = vperm.xlu1 %2464, %v1370_v34   ;;  %v289_v44 = vadd.f32 %v288_v27, %v287_v61 }
  0xee   : > { %v290_v30 = vrot.slane %v289_v44, 1 }
  0xf0   : > { %1497 = vperm.xlu1 %2464, %v1371_v7   ;;  %v291_v51 = vadd.f32 %v290_v30, %v289_v44 }
  0xf2   : > { %2389 = vpush %v291_v51  ;;  %v2751_v51 = vmov 8  }
  0xf3   : > { %2465 = vset.pattern.permute.xlu0 %v2751_v51 }
  0xf4   : > { %1502 = vperm.xlu1 %2464, %v1372_v42  }
  0xf8   : > { %1507 = vperm.xlu1 %2464, %v1373_v45  }
  0xfc   : > { %1512 = vperm.xlu1 %2464, %v1374_v18  }
 0x100   : > { %1517 = vperm.xlu1 %2464, %v1375_v58  }
 0x104   : > { %1522 = vperm.xlu1 %2464, %v1376_v47  }
 0x108   : > { %1527 = vperm.xlu1 %2464, %v1377_v35  }
 0x10c   : > { %1532 = vperm.xlu1 %2464, %v1378_v26  }
 0x110   : > { %1537 = vperm.xlu1 %2464, %v1379_v36  }
 0x114   : > { %2466 = vset.pattern.permute.xlu1 %v2751_v51 }
 0x123   : > { %s2390_s15 = spop %2389 }
 0x12e   : > { %v1383_v63 = vpop.permute.xlu1 %1382 }
 0x132   : > { %v1388_v46 = vpop.permute.xlu1 %1387 }
 0x136   : > { %v1393_v53 = vpop.permute.xlu1 %1392  ;;  %v1403_v20 = vpop.permute.xlu0 %1402 }
 0x13a   : > { %v1398_v48 = vpop.permute.xlu1 %1397 }
 0x13e   : > { %v1408_v54 = vpop.permute.xlu1 %1407 }
 0x142   : > { %v1413_v55 = vpop.permute.xlu1 %1412 }
 0x144   : > { %v1433_v34 = vpop.permute.xlu0 %1432 }
 0x146   : > { %v1418_v56 = vpop.permute.xlu1 %1417 }
 0x148   : > { %v1438_v7 = vpop.permute.xlu0 %1437 }
 0x14a   : > { %v1423_v59 = vpop.permute.xlu1 %1422 }
 0x14c   : > { %v1443_v44 = vpop.permute.xlu0 %1442 }
 0x14e   : > { %v1428_v4 = vpop.permute.xlu1 %1427 }
 0x150   : > { %v1448_v58 = vpop.permute.xlu0 %1447 }
 0x153   : > { %v1463_v41 = vpop.permute.xlu1 %1462 }
 0x154   : > { %v1540_v6 = vsel %vm1363_vm6, %v1383_v63, %v1463_v41  ;;  %v1453_v63 = vpop.permute.xlu0 %1452 }
 0x155   : > { %1572 = vrot.lane.b32.xlu0 %v1540_v6, %s2750_s5 }
 0x157   : > { %v1468_v12 = vpop.permute.xlu1 %1467 }
 0x158   : > { %v1541_v15 = vsel %vm1363_vm6, %v1388_v46, %v1468_v12 }
 0x159   : > { %1574 = vrot.lane.b32.xlu1 %v1541_v15, %s2750_s5 }
 0x15b   : > { %v1473_v13 = vpop.permute.xlu1 %1472 }
 0x15c   : > { %v1542_v50 = vsel %vm1363_vm6, %v1393_v53, %v1473_v13 }
 0x15d   : > { %1576 = vrot.lane.b32.xlu0 %v1542_v50, %s2750_s5 }
 0x15f   : > { %v1478_v14 = vpop.permute.xlu1 %1477 }
 0x160   : > { %v1543_v19 = vsel %vm1363_vm6, %v1398_v48, %v1478_v14  ;;  %v1458_v48 = vpop.permute.xlu0 %1457 }
 0x161   : > { %1578 = vrot.lane.b32.xlu1 %v1543_v19, %s2750_s5 }
 0x163   : > { %v1483_v52 = vpop.permute.xlu1 %1482 }
 0x164   : > { %v1544_v23 = vsel %vm1363_vm6, %v1403_v20, %v1483_v52 }
 0x165   : > { %1580 = vrot.lane.b32.xlu0 %v1544_v23, %s2750_s5 }
 0x167   : > { %v1488_v57 = vpop.permute.xlu1 %1487 }
 0x168   : > { %v1545_v62 = vsel %vm1363_vm6, %v1408_v54, %v1488_v57 }
 0x169   : > { %1582 = vrot.lane.b32.xlu1 %v1545_v62, %s2750_s5 }
 0x16b   : > { %v1493_v3 = vpop.permute.xlu1 %1492 }
 0x16c   : > { %v1546_v21 = vsel %vm1363_vm6, %v1413_v55, %v1493_v3 }
 0x16d   : > { %1584 = vrot.lane.b32.xlu0 %v1546_v21, %s2750_s5 }
 0x16f   : > { %v1498_v37 = vpop.permute.xlu1 %1497 }
 0x170   : > { %v1547_v31 = vsel %vm1363_vm6, %v1418_v56, %v1498_v37  ;;  %v223_v56 = vadd.f32 1e-06, %v2991_v49 }
 0x171   : > { %1586 = vrot.lane.b32.xlu1 %v1547_v31, %s2750_s5 }
 0x172   : > { %2582 = vrcp.f32 %v223_v56 }
 0x173   : > { %v1503_v22 = vpop.permute.xlu1 %1502 }
 0x174   : > { %v1548_v38 = vsel %vm1363_vm6, %v1423_v59, %v1503_v22  ;;  %v3213_v59 = vshrl.u32 %v373_v40, 7 }
 0x175   : > { %1588 = vrot.lane.b32.xlu0 %v1548_v38, %s2750_s5 }
 0x176   : > { %v787_v6 = vsub.s32 2, %v3213_v59  ;;  %vm1638_vm7 = vcmp.lt.s32.totalorder %v3213_v59, 2 }
 0x177   : > { %v1508_v61 = vpop.permute.xlu1 %1507 }
 0x178   : > { %v1549_v42 = vsel %vm1363_vm6, %v1428_v4, %v1508_v61  ;;  %v375_v4 = vsub.s32 0, %v3213_v59 }
 0x179   : > { %1590 = vrot.lane.b32.xlu1 %v1549_v42, %s2750_s5 }
 0x17b   : > { %v1513_v27 = vpop.permute.xlu1 %1512 }
 0x17c   : > { %v1550_v45 = vsel %vm1363_vm6, %v1433_v34, %v1513_v27  ;;  %v2583_v41 = vpop.eup %2582 }
 0x17d   : > { %1592 = vrot.lane.b32.xlu0 %v1550_v45, %s2750_s5  ;;  %v1642_v12 = vrot.slane %v2583_v41, %v375_v4  ;;  %v1646_v60 = vrot.slane %v2583_v41, %v787_v6  ;;  %v3326_v41 = vld [vmem:[%s2833_s27 + $0x50] sm:$0xff] }
 0x17f   : > { %v1518_v30 = vpop.permute.xlu1 %1517  ;;  %v1647_v15 = vsel %vm1638_vm7, %v1642_v12, %v1646_v60  ;;  %v3334_v60 = vld [vmem:[%s2833_s27 + $0x68] sm:$0xff] }
 0x180   : > { %v1551_v18 = vsel %vm1363_vm6, %v1438_v7, %v1518_v30  ;;  %v1648_v49 = vmul.f32 %v1647_v15, %v2879_v10  ;;  %v1880_v13 = vrot.slane %v1647_v15, 4 }
 0x181   : > { %1594 = vrot.lane.b32.xlu1 %v1551_v18, %s2750_s5 }
 0x182   : > { %2336 = vmatprep.subr.msk.mxu0 %vm1730_vm8, %v1648_v49  ;;  %v1882_v40 = vmul.f32 %v1880_v13, %v2879_v10 }
 0x183   : > { %v1523_v47 = vpop.permute.xlu1 %1522  ;;  %2337 = vmatpush3.msk.msra.mxu0 %vm1730_vm8, %v1648_v49 }
 0x184   : > { %v1552_v35 = vsel %vm1363_vm6, %v1443_v44, %v1523_v47  ;;  %v1884_v50 = vrot.slane %v1882_v40, 4 }
 0x185   : > { %1596 = vrot.lane.b32.xlu0 %v1552_v35, %s2750_s5 }
 0x186   : > { %2362 = vmatprep.subr.msk.mxu1 %vm1730_vm8, %v1884_v50 }
 0x187   : > { %v1528_v26 = vpop.permute.xlu1 %1527  ;;  %2363 = vmatpush3.msk.msra.mxu1 %vm1730_vm8, %v1884_v50 }
 0x188   : > { %v1553_v36 = vsel %vm1363_vm6, %v1448_v58, %v1528_v26  ;;  %v3256_v26 = vld [vmem:[%s2833_s27 + $0x10] sm:$0xff] }
 0x189   : > { %1598 = vrot.lane.b32.xlu1 %v1553_v36, %s2750_s5  ;;  %v2649_v36 = vld [vmem:[%s2833_s27] sm:$0xff] }
 0x18b   : > { %v1533_v46 = vpop.permute.xlu1 %1532 }
 0x18c   : > { %v1554_v53 = vsel %vm1363_vm6, %v1453_v63, %v1533_v46  ;;  %v3262_v46 = vld [vmem:[%s2833_s27 + $0x18] sm:$0xff] }
 0x18d   : > { %1600 = vrot.lane.b32.xlu0 %v1554_v53, %s2750_s5 }
 0x18f   : > { %v1538_v54 = vpop.permute.xlu1 %1537 }
 0x190   : > { %v1555_v55 = vsel %vm1363_vm6, %v1458_v48, %v1538_v54  ;;  %v2656_v48 = vld [vmem:[%s2833_s27 + $0x20] sm:$0xff] }
 0x191   : > { %1602 = vrot.lane.b32.xlu1 %v1555_v55, %s2750_s5  ;;  %v3318_v55 = vld [vmem:[%s2833_s27 + $0x38] sm:$0xff] }
 0x1c7   : > { %v1573_v14 = vpop.permute.xlu0 %1572 }
 0x1c8   : > { %v1620_v19 = vmul.f32 %v1573_v14, %v2839_v1 }
 0x1ca   : > { %1665 = vrot.lane.b32.xlu0 %v1620_v19, %s2752_s6 }
 0x1cb   : > { %v1575_v20 = vpop.permute.xlu1 %1574 }
 0x1cc   : > { %v1621_v52 = vmul.f32 %v1575_v20, %v2853_v5 }
 0x1ce   : > { %1667 = vrot.lane.b32.xlu1 %v1621_v52, %s2752_s6  ;;  %v2660_v52 = vld [vmem:[%s2833_s27 + $0x40] sm:$0xff] }
 0x1cf   : > { %v1577_v23 = vpop.permute.xlu0 %1576 }
 0x1d0   : > { %v1622_v57 = vmul.f32 %v1577_v23, %v2836_v0  ;;  %v3375_v23 = vld [vmem:[%s2833_s27 + $0x58] sm:$0xff] }
 0x1d2   : > { %1669 = vrot.lane.b32.xlu0 %v1622_v57, %s2752_s6  ;;  %v3380_v57 = vld [vmem:[%s2833_s27 + $0x70] sm:$0xff] }
 0x1d3   : > { %v1579_v10 = vpop.permute.xlu1 %1578 }
 0x1d4   : > { %v1623_v62 = vmul.f32 %v1579_v10, %v2842_v2 }
 0x1d6   : > { %1671 = vrot.lane.b32.xlu1 %v1623_v62, %s2752_s6  ;;  %v3389_v62 = vld [vmem:[%s2833_s27 + $0x78] sm:$0xff] }
 0x1d7   : > { %v1581_v1 = vpop.permute.xlu0 %1580 }
 0x1d8   : > { %v1624_v3 = vmul.f32 %v1581_v1, %v2876_v9  ;;  %v3395_v1 = vld [vmem:[%s2870_s4 + $0x10] ss:$0 sm:$0xff] }
 0x1da   : > { %1673 = vrot.lane.b32.xlu0 %v1624_v3, %s2752_s6 }
 0x1db   : > { %v1583_v21 = vpop.permute.xlu1 %1582 }
 0x1dc   : > { %v1625_v37 = vmul.f32 %v1583_v21, %v2873_v8 }
 0x1de   : > { %1675 = vrot.lane.b32.xlu1 %v1625_v37, %s2752_s6 }
 0x1df   : > { %v1585_v31 = vpop.permute.xlu0 %1584 }
 0x1e0   : > { %v1626_v0 = vmul.f32 %v1585_v31, %v2904_v17 }
 0x1e2   : > { %1677 = vrot.lane.b32.xlu0 %v1626_v0, %s2752_s6 }
 0x1e3   : > { %v1587_v34 = vpop.permute.xlu1 %1586 }
 0x1e4   : > { %v1627_v2 = vmul.f32 %v1587_v34, %v2901_v16 }
 0x1e6   : > { %1679 = vrot.lane.b32.xlu1 %v1627_v2, %s2752_s6 }
 0x1e7   : > { %v1589_v22 = vpop.permute.xlu0 %1588 }
 0x1e8   : > { %v1628_v38 = vmul.f32 %v1589_v22, %v2919_v24 }
 0x1ea   : > { %1681 = vrot.lane.b32.xlu0 %v1628_v38, %s2752_s6 }
 0x1eb   : > { %v1591_v7 = vpop.permute.xlu1 %1590 }
 0x1ec   : > { %v1629_v61 = vmul.f32 %v1591_v7, %v2922_v25 }
 0x1ee   : > { %1683 = vrot.lane.b32.xlu1 %v1629_v61, %s2752_s6 }
 0x1ef   : > { %v1593_v42 = vpop.permute.xlu0 %1592 }
 0x1f0   : > { %v1630_v27 = vmul.f32 %v1593_v42, %v2937_v28 }
 0x1f2   : > { %1685 = vrot.lane.b32.xlu0 %v1630_v27, %s2752_s6 }
 0x1f3   : > { %v1595_v45 = vpop.permute.xlu1 %1594 }
 0x1f4   : > { %v1631_v44 = vmul.f32 %v1595_v45, %v2940_v29 }
 0x1f6   : > { %1687 = vrot.lane.b32.xlu1 %v1631_v44, %s2752_s6 }
 0x1f7   : > { %v1597_v30 = vpop.permute.xlu0 %1596 }
 0x1f8   : > { %v1632_v18 = vmul.f32 %v1597_v30, %v2955_v32 }
 0x1fa   : > { %1689 = vrot.lane.b32.xlu0 %v1632_v18, %s2752_s6 }
 0x1fb   : > { %v1599_v51 = vpop.permute.xlu1 %1598 }
 0x1fc   : > { %v1633_v58 = vmul.f32 %v1599_v51, %v2958_v33 }
 0x1fe   : > { %1691 = vrot.lane.b32.xlu1 %v1633_v58, %s2752_s6 }
 0x1ff   : > { %v1601_v47 = vpop.permute.xlu0 %1600 }
 0x200   : > { %v1634_v35 = vmul.f32 %v1601_v47, %v2973_v39  ;;  %v543_v47 = vsub.s32 1, %v3213_v59 }
 0x202   : > { %300 = vperm.xlu1 %2466, %v2853_v5   ;;  %1693 = vrot.lane.b32.xlu0 %v1634_v35, %s2752_s6  ;;  %v2753_v5 = vmov 0  }
 0x203   : > { %v1603_v63 = vpop.permute.xlu1 %1602 }
 0x204   : > { %v1635_v53 = vmul.f32 %v1603_v63, %v2976_v43 }
 0x206   : > { %305 = vperm.xlu1 %2466, %v3256_v26   ;;  %295 = vperm.xlu0 %2465, %v2649_v36  }
 0x20a   : > { %315 = vperm.xlu1 %2466, %v2876_v9   ;;  %310 = vperm.xlu0 %2465, %v3262_v46   ;;  %v2651_v9 = vld [vmem:[%s2833_s27 + $0x8] sm:$0xff] }
 0x20e   : > { %1695 = vrot.lane.b32.xlu1 %v1635_v53, %s2752_s6  ;;  %320 = vperm.xlu0 %2465, %v2873_v8   ;;  %v2754_v8 = vmov 2  }
 0x212   : > { %325 = vperm.xlu1 %2466, %v2904_v17   ;;  %330 = vperm.xlu0 %2465, %v2901_v16   ;;  %v2755_v16 = vmov 1   ;;  %v3286_v17 = vld [vmem:[%s2833_s27 + $0x28] sm:$0xff] }
 0x216   : > { %335 = vperm.xlu1 %2466, %v2919_v24   ;;  %340 = vperm.xlu0 %2465, %v2922_v25   ;;  %v3292_v24 = vld [vmem:[%s2833_s27 + $0x30] sm:$0xff]  ;;  %v3297_v25 = vld [vmem:[%s2833_s27 + $0x48] sm:$0xff] }
 0x21a   : > { %345 = vperm.xlu1 %2466, %v2937_v28   ;;  %350 = vperm.xlu0 %2465, %v2940_v29  }
 0x21e   : > { %355 = vperm.xlu1 %2466, %v2955_v32   ;;  %360 = vperm.xlu0 %2465, %v2958_v33   ;;  %v3303_v32 = vld [vmem:[%s2833_s27 + $0x60] sm:$0xff]  ;;  %v2756_v33 = vmov 3  }
 0x222   : > { %365 = vperm.xlu1 %2466, %v2973_v39   ;;  %370 = vperm.xlu0 %2465, %v2976_v43  }
 0x226   : > { %2467 = vset.pattern.permute.xlu1 %v2753_v5  ;;  %2470 = vset.pattern.permute.xlu0 %v2754_v8 }
 0x227   : > { %394 = vperm.xlu1 %2467, %v2649_v36   ;;  %726 = vperm.xlu0 %2470, %v2651_v9  }
 0x22b   : > { %402 = vperm.xlu1 %2467, %v3256_v26   ;;  %2471 = vset.pattern.permute.xlu0 %v2755_v16 }
 0x22c   : > { %478 = vperm.xlu0 %2471, %v2649_v36  }
 0x22f   : > { %406 = vperm.xlu1 %2467, %v3262_v46  }
 0x230   : > { %486 = vperm.xlu0 %2471, %v3256_v26  }
 0x233   : > { %414 = vperm.xlu1 %2467, %v3286_v17  }
 0x234   : > { %490 = vperm.xlu0 %2471, %v3262_v46  }
 0x237   : > { %2468 = vset.pattern.permute.xlu1 %v2755_v16 }
 0x238   : > { %482 = vperm.xlu1 %2468, %v2651_v9   ;;  %502 = vperm.xlu0 %2471, %v3292_v24  }
 0x23c   : > { %2469 = vset.pattern.permute.xlu1 %v2754_v8  ;;  %514 = vperm.xlu0 %2471, %v3297_v25   ;;  %v1666_v28 = vpop.permute.xlu0 %1665 }
 0x23d   : > { %722 = vperm.xlu1 %2469, %v2649_v36   ;;  %2338 = vmatprep.mubr.msk.f32.mxu0 %vm1697_vm9, %v1666_v28 }
 0x23e   : > { %2364 = vmatprep.mubr.msk.f32.mxu1 %vm1697_vm9, %v1666_v28 }
 0x240   : > { %v1668_v29 = vpop.permute.xlu1 %1667  ;;  %526 = vperm.xlu0 %2471, %v3303_v32  }
 0x241   : > { %2472 = vset.pattern.permute.xlu1 %v2756_v33  ;;  %2339 = vmatmul.mubr.msk.f32.vlgmr.msra.gmra.mrb[0].mxu0 %vm1697_vm9, %v1668_v29 }
 0x242   : > { %2365 = vmatmul.mubr.msk.f32.vlgmr.msra.gmra.mrb[0].mxu1 %vm1697_vm9, %v1668_v29  ;;  %806 = vperm.xlu1 %2472, %v2649_v36   ;;  %v2665_v36 = vld [vmem:[%s2870_s4 + $0x8] sm:$0xff]  ;;  %s2757_s4 = smov [#allocation2]  }
 0x243   : > { %v3475_v63 = vrot.slane %v2665_v36, %v543_v47  ;;  %v3493_v29 = vrot.slane %v2665_v36, %v787_v6  ;;  %s2671_s5 = sshll.u32 %s2757_s4, 4  ;;  %s2672_s5 = int_to_ptr.vmem [resolvable:$false] %s2671_s5 }
 0x244   : > { %2497 = vset.pattern.permute.xlu0 %v2753_v5  ;;  %v1670_v39 = vpop.permute.xlu0 %1669  ;;  %s2673_s6 = scalar_lea.vmem %s2672_s5, 256  ;;  %p2674_p1 = scmp.lt.s32.totalorder %s3984_s26, %s2672_s5 }
 0x245   : > { %398 = vperm.xlu0 %2497, %v2651_v9   ;;  %2341 = vmatprep.mubr.msk.f32.mxu0 %vm1697_vm9, %v1670_v39  ;;  %p2675_p2 = scmp.lt.s32.totalorder %s2673_s6, %s2667_s3 }
 0x246   : > { %2367 = vmatprep.mubr.msk.f32.mxu1 %vm1697_vm9, %v1670_v39  ;;  %810 = vperm.xlu1 %2472, %v2651_v9   ;;  %v3483_v9 = vrot.slane %v2665_v36, %v375_v4  ;;  %v871_v4 = vsub.s32 3, %v3213_v59 }
 0x247   : > { %p2676_p3 = por %p2675_p2, %p2674_p1 }
 0x248   : > { %v1672_v43 = vpop.permute.xlu1 %1671 }
 0x249   : > { %410 = vperm.xlu0 %2497, %v2656_v48   ;;  %2342 = vmatmul.mubr.msk.f32.gmra.mrb[2].mxu0 %vm1697_vm9, %v1672_v43  ;;  %p2677_p5 = pnand %p2676_p3, %p2670_p0 }
 0x24a   : > { %2368 = vmatmul.mubr.msk.f32.gmra.mrb[2].mxu1 %vm1697_vm9, %v1672_v43  ;;  %2473 = vset.pattern.permute.xlu1 %v2754_v8 }
 0x24b   : > { %730 = vperm.xlu1 %2473, %v3256_v26  }
 0x24c   : > { %v1674_v54 = vpop.permute.xlu0 %1673 }
 0x24d   : > { %422 = vperm.xlu0 %2497, %v3318_v55   ;;  %2344 = vmatprep.mubr.msk.f32.mxu0 %vm1697_vm9, %v1674_v54 }
 0x24e   : > { %2370 = vmatprep.mubr.msk.f32.mxu1 %vm1697_vm9, %v1674_v54 }
 0x24f   : > { %2474 = vset.pattern.permute.xlu1 %v2756_v33 }
 0x250   : > { %814 = vperm.xlu1 %2474, %v3256_v26   ;;  %v1676_v56 = vpop.permute.xlu1 %1675 }
 0x251   : > { %434 = vperm.xlu0 %2497, %v3326_v41   ;;  %2345 = vmatmul.mubr.msk.f32.gmra.mrb[4].mxu0 %vm1697_vm9, %v1676_v56 }
 0x252   : > { %2371 = vmatmul.mubr.msk.f32.gmra.mrb[4].mxu1 %vm1697_vm9, %v1676_v56  ;;  %v3501_v56 = vrot.slane %v2665_v36, %v871_v4 }
 0x254   : > { %2475 = vset.pattern.permute.xlu1 %v2754_v8  ;;  %v1678_v12 = vpop.permute.xlu0 %1677 }
 0x255   : > { %734 = vperm.xlu1 %2475, %v3262_v46   ;;  %446 = vperm.xlu0 %2497, %v3334_v60  }
 0x256   : > { %2347 = vmatprep.mubr.msk.f32.mxu0 %vm1697_vm9, %v1678_v12  ;;  %2373 = vmatprep.mubr.msk.f32.mxu1 %vm1697_vm9, %v1678_v12 }
 0x258   : > { %v1680_v15 = vpop.permute.xlu1 %1679 }
 0x259   : > { %2476 = vset.pattern.permute.xlu1 %v2755_v16  ;;  %2500 = vset.pattern.permute.xlu0 %v2756_v33 }
 0x25a   : > { %2348 = vmatmul.mubr.msk.f32.gmra.mrb[6].mxu0 %vm1697_vm9, %v1680_v15  ;;  %2374 = vmatmul.mubr.msk.f32.gmra.mrb[6].mxu1 %vm1697_vm9, %v1680_v15 }
 0x25b   : > { %494 = vperm.xlu1 %2476, %v2656_v48   ;;  %818 = vperm.xlu0 %2500, %v3262_v46  }
 0x25c   : > { %v1682_v49 = vpop.permute.xlu0 %1681 }
 0x25d   : > { %2350 = vmatprep.mubr.msk.f32.mxu0 %vm1697_vm9, %v1682_v49  ;;  %2376 = vmatprep.mubr.msk.f32.mxu1 %vm1697_vm9, %v1682_v49 }
 0x25f   : > { %2477 = vset.pattern.permute.xlu1 %v2754_v8  ;;  %822 = vperm.xlu0 %2500, %v2656_v48  }
 0x260   : > { %738 = vperm.xlu1 %2477, %v2656_v48   ;;  %v1684_v13 = vpop.permute.xlu1 %1683 }
 0x261   : > { %2351 = vmatmul.mubr.msk.f32.gmra.mrb[8].mxu0 %vm1697_vm9, %v1684_v13  ;;  %2377 = vmatmul.mubr.msk.f32.gmra.mrb[8].mxu1 %vm1697_vm9, %v1684_v13 }
 0x263   : > { %834 = vperm.xlu0 %2500, %v3318_v55  }
 0x264   : > { %2478 = vset.pattern.permute.xlu1 %v2755_v16  ;;  %v1686_v40 = vpop.permute.xlu0 %1685 }
 0x265   : > { %498 = vperm.xlu1 %2478, %v3286_v17   ;;  %2353 = vmatprep.mubr.msk.f32.mxu0 %vm1697_vm9, %v1686_v40 }
 0x266   : > { %2379 = vmatprep.mubr.msk.f32.mxu1 %vm1697_vm9, %v1686_v40 }
 0x267   : > { %846 = vperm.xlu0 %2500, %v3326_v41  }
 0x268   : > { %v1688_v50 = vpop.permute.xlu1 %1687 }
 0x269   : > { %2479 = vset.pattern.permute.xlu1 %v2756_v33  ;;  %2354 = vmatmul.mubr.msk.f32.gmra.mrb[10].mxu0 %vm1697_vm9, %v1688_v50 }
 0x26a   : > { %826 = vperm.xlu1 %2479, %v3286_v17   ;;  %2380 = vmatmul.mubr.msk.f32.gmra.mrb[10].mxu1 %vm1697_vm9, %v1688_v50 }
 0x26b   : > { %858 = vperm.xlu0 %2500, %v3334_v60  }
 0x26c   : > { %v1690_v14 = vpop.permute.xlu0 %1689 }
 0x26d   : > { %2356 = vmatprep.mubr.msk.f32.mxu0 %vm1697_vm9, %v1690_v14  ;;  %2382 = vmatprep.mubr.msk.f32.mxu1 %vm1697_vm9, %v1690_v14 }
 0x26e   : > { %2480 = vset.pattern.permute.xlu1 %v2753_v5 }
 0x26f   : > { %418 = vperm.xlu1 %2480, %v3292_v24   ;;  %2503 = vset.pattern.permute.xlu0 %v2754_v8 }
 0x270   : > { %742 = vperm.xlu0 %2503, %v3286_v17   ;;  %v1692_v19 = vpop.permute.xlu1 %1691 }
 0x271   : > { %2357 = vmatmul.mubr.msk.f32.gmra.mrb[12].mxu0 %vm1697_vm9, %v1692_v19  ;;  %2383 = vmatmul.mubr.msk.f32.gmra.mrb[12].mxu1 %vm1697_vm9, %v1692_v19 }
 0x273   : > { %2481 = vset.pattern.permute.xlu1 %v2754_v8 }
 0x274   : > { %746 = vperm.xlu1 %2481, %v3292_v24   ;;  %v1694_v20 = vpop.permute.xlu0 %1693  ;;  %754 = vperm.xlu0 %2503, %v2660_v52  }
 0x275   : > { %2359 = vmatprep.mubr.msk.f32.mxu0 %vm1697_vm9, %v1694_v20  ;;  %2385 = vmatprep.mubr.msk.f32.mxu1 %vm1697_vm9, %v1694_v20 }
 0x278   : > { %2482 = vset.pattern.permute.xlu1 %v2756_v33  ;;  %766 = vperm.xlu0 %2503, %v3375_v23  }
 0x279   : > { %830 = vperm.xlu1 %2482, %v3292_v24  }
 0x27c   : > { %778 = vperm.xlu0 %2503, %v3380_v57  }
 0x27d   : > { %2483 = vset.pattern.permute.xlu1 %v2755_v16 }
 0x27e   : > { %506 = vperm.xlu1 %2483, %v3318_v55  }
 0x280   : > { %2508 = vset.pattern.permute.xlu0 %v2755_v16 }
 0x281   : > { %v3386_v10 = vpop.permute.xlu1 %300  ;;  %538 = vperm.xlu0 %2508, %v3389_v62  }
 0x282   : > { %2484 = vset.pattern.permute.xlu1 %v2754_v8 }
 0x283   : > { %750 = vperm.xlu1 %2484, %v3318_v55  }
 0x285   : > { %v3397_v3 = vpop.permute.xlu1 %305  ;;  %v3399_v21 = vpop.permute.xlu0 %295  ;;  %2511 = vset.pattern.permute.xlu0 %v2749_v11 }
 0x286   : > { %vm377_vm10 = vcmp.lt.f32.partialorder %v3399_v21, %v3395_v1 }
 0x287   : > { %2485 = vset.pattern.permute.xlu1 %v2753_v5 }
 0x288   : > { %426 = vperm.xlu1 %2485, %v2660_v52  }
 0x289   : > { %v3405_v37 = vpop.permute.xlu1 %315  ;;  %v3407_v31 = vpop.permute.xlu0 %310 }
 0x28a   : > { %vm380_vm11 = vcmp.lt.f32.partialorder %v3407_v31, %v3395_v1 }
 0x28c   : > { %2486 = vset.pattern.permute.xlu1 %v2755_v16 }
 0x28d   : > { %510 = vperm.xlu1 %2486, %v2660_v52   ;;  %v1696_v0 = vpop.permute.xlu1 %1695  ;;  %v3412_v34 = vpop.permute.xlu0 %320 }
 0x28e   : > { %2360 = vmatmul.mubr.msk.f32.gmra.mrb[14].mxu0 %vm1697_vm9, %v1696_v0  ;;  %2386 = vmatmul.mubr.msk.f32.gmra.mrb[14].mxu1 %vm1697_vm9, %v1696_v0  ;;  %vm382_vm12 = vcmp.lt.f32.partialorder %v3412_v34, %v3395_v1 }
 0x291   : > { %2487 = vset.pattern.permute.xlu1 %v2756_v33  ;;  %v3419_v11 = vpop.permute.xlu1 %325  ;;  %v3421_v2 = vpop.permute.xlu0 %330 }
 0x292   : > { %838 = vperm.xlu1 %2487, %v2660_v52   ;;  %vm383_vm13 = vcmp.lt.f32.partialorder %v3419_v11, %v3395_v1  ;;  %vm384_vm14 = vcmp.lt.f32.partialorder %v3421_v2, %v3395_v1 }
 0x295   : > { %v3427_v22 = vpop.permute.xlu1 %335  ;;  %v3429_v38 = vpop.permute.xlu0 %340 }
 0x296   : > { %2488 = vset.pattern.permute.xlu1 %v2753_v5  ;;  %vm385_vm15 = vcmp.lt.f32.partialorder %v3427_v22, %v3395_v1  ;;  %vm386_vm0 = vcmp.lt.f32.partialorder %v3429_v38, %v3395_v1 }
 0x297   : > { %430 = vperm.xlu1 %2488, %v3297_v25  }
 0x299   : > { %v3437_v7 = vpop.permute.xlu1 %345  ;;  %v3439_v61 = vpop.permute.xlu0 %350 }
 0x29a   : > { %vm387_vm1 = vcmp.lt.f32.partialorder %v3437_v7, %v3395_v1  ;;  %vm388_vm2 = vcmp.lt.f32.partialorder %v3439_v61, %v3395_v1 }
 0x29b   : > { %2489 = vset.pattern.permute.xlu1 %v2754_v8 }
 0x29c   : > { %758 = vperm.xlu1 %2489, %v3297_v25  }
 0x29d   : > { %v3447_v42 = vpop.permute.xlu1 %355  ;;  %v3449_v27 = vpop.permute.xlu0 %360 }
 0x2a0   : > { %2490 = vset.pattern.permute.xlu1 %v2756_v33 }
 0x2a1   : > { %842 = vperm.xlu1 %2490, %v3297_v25   ;;  %v3457_v45 = vpop.permute.xlu1 %365  ;;  %v3459_v44 = vpop.permute.xlu0 %370 }
 0x2a5   : > { %2491 = vset.pattern.permute.xlu1 %v2755_v16 }
 0x2a6   : > { %518 = vperm.xlu1 %2491, %v3326_v41   ;;  %v395_v30 = vpop.permute.xlu1 %394  ;;  %v727_v18 = vpop.permute.xlu0 %726 }
 0x2a7   : > { %v461_v28 = vsub.f32 %v395_v30, %v3483_v9  ;;  %v790_v40 = vsub.f32 %v727_v18, %v3493_v29 }
 0x2a9   : > { %v561_v48 = vmul.f32 %v461_v28, %v461_v28  ;;  %v890_v36 = vmul.f32 %v790_v40, %v790_v40 }
 0x2aa   : > { %2492 = vset.pattern.permute.xlu1 %v2754_v8  ;;  %v403_v51 = vpop.permute.xlu1 %402 }
 0x2ab   : > { %762 = vperm.xlu1 %2492, %v3326_v41   ;;  %v479_v58 = vpop.permute.xlu0 %478  ;;  %v463_v20 = vsub.f32 %v403_v51, %v3483_v9 }
 0x2ac   : > { %v545_v17 = vsub.f32 %v479_v58, %v3475_v63 }
 0x2ae   : > { %v3470_v35 = vpop.permute.xlu1 %406  ;;  %v577_v39 = vmul.f32 %v545_v17, %v545_v17  ;;  %v563_v17 = vmul.f32 %v463_v20, %v463_v20 }
 0x2af   : > { %2493 = vset.pattern.permute.xlu1 %v2753_v5  ;;  %v487_v26 = vpop.permute.xlu0 %486 }
 0x2b0   : > { %438 = vperm.xlu1 %2493, %v3375_v23   ;;  %v3503_v41 = vadd.f32 %v577_v39, %v561_v48  ;;  %v547_v49 = vsub.f32 %v487_v26, %v3475_v63 }
 0x2b2   : > { %v3477_v46 = vpop.permute.xlu1 %414  ;;  %2584 = vrsqrt.f32 %v3503_v41  ;;  %v579_v58 = vmul.f32 %v547_v49, %v547_v49  ;;  %vm611_vm7 = vcmp.eq.f32.partialorder %v3503_v41, inf  ;;  %vm613_vm8 = vcmp.eq.f32.partialorder %v3503_v41, 0.0 }
 0x2b3   : > { %v3479_v53 = vpop.permute.xlu0 %490 }
 0x2b4   : > { %2494 = vset.pattern.permute.xlu1 %v2755_v16  ;;  %v3521_v4 = vadd.f32 %v579_v58, %v563_v17  ;;  %v548_v49 = vsub.f32 %v3479_v53, %v3475_v63 }
 0x2b5   : > { %522 = vperm.xlu1 %2494, %v3375_v23  }
 0x2b6   : > { %v580_v53 = vmul.f32 %v548_v49, %v548_v49 }
 0x2b7   : > { %v483_v24 = vpop.permute.xlu1 %482  ;;  %v3488_v25 = vpop.permute.xlu0 %502 }
 0x2b8   : > { %v546_v13 = vsub.f32 %v483_v24, %v3475_v63 }
 0x2b9   : > { %2495 = vset.pattern.permute.xlu1 %v2756_v33 }
 0x2ba   : > { %850 = vperm.xlu1 %2495, %v3375_v23   ;;  %v578_v47 = vmul.f32 %v546_v13, %v546_v13 }
 0x2bb   : > { %v3498_v43 = vpop.permute.xlu0 %514 }
 0x2bc   : > { %v723_v54 = vpop.permute.xlu1 %722  ;;  %v2585_v39 = vpop.eup %2584 }
 0x2bd   : > { %v789_v55 = vsub.f32 %v723_v54, %v3493_v29 }
 0x2be   : > { %2496 = vset.pattern.permute.xlu1 %v2753_v5 }
 0x2bf   : > { %442 = vperm.xlu1 %2496, %v3303_v32   ;;  %v3507_v6 = vpop.permute.xlu0 %526  ;;  %v889_v50 = vmul.f32 %v789_v55, %v789_v55 }
 0x2c1   : > { %v807_v12 = vpop.permute.xlu1 %806 }
 0x2c2   : > { %v873_v15 = vsub.f32 %v807_v12, %v3501_v56  ;;  %v464_v12 = vsub.f32 %v3470_v35, %v3483_v9 }
 0x2c3   : > { %2498 = vset.pattern.permute.xlu1 %v2754_v8 }
 0x2c4   : > { %v905_v14 = vmul.f32 %v873_v15, %v873_v15  ;;  %770 = vperm.xlu1 %2498, %v3303_v32   ;;  %v399_v19 = vpop.permute.xlu0 %398  ;;  %v564_v35 = vmul.f32 %v464_v12, %v464_v12 }
 0x2c5   : > { %v462_v52 = vsub.f32 %v399_v19, %v3483_v9  ;;  %v811_v23 = vpop.permute.xlu1 %810 }
 0x2c6   : > { %v921_v0 = vadd.f32 %v905_v14, %v889_v50  ;;  %v874_v30 = vsub.f32 %v811_v23, %v3501_v56 }
 0x2c7   : > { %v562_v26 = vmul.f32 %v462_v52, %v462_v52  ;;  %v614_v52 = vand.u32 2147483648, %v3503_v41 }
 0x2c8   : > { %2586 = vrsqrt.f32 %v921_v0  ;;  %2499 = vset.pattern.permute.xlu1 %v2756_v33  ;;  %v411_v18 = vpop.permute.xlu0 %410  ;;  %v906_v28 = vmul.f32 %v874_v30, %v874_v30  ;;  %vm939_vm9 = vcmp.eq.f32.partialorder %v921_v0, inf  ;;  %v942_v30 = vand.u32 2147483648, %v921_v0 }
 0x2c9   : > { %v594_v24 = vadd.f32 %v578_v47, %v562_v26  ;;  %854 = vperm.xlu1 %2499, %v3303_v32   ;;  %v610_v32 = vmul.f32 %v2585_v39, %v3503_v41  ;;  %vm941_vm5 = vcmp.eq.f32.partialorder %v921_v0, 0.0 }
 0x2ca   : > { %v731_v51 = vpop.permute.xlu1 %730  ;;  %v3523_v48 = vadd.f32 %v906_v28, %v890_v36  ;;  %v465_v28 = vsub.f32 %v411_v18, %v3483_v9 }
 0x2cb   : > { %2588 = vrsqrt.f32 %v594_v24  ;;  %v791_v54 = vsub.f32 %v731_v51, %v3493_v29  ;;  %v612_v20 = vsel %vm611_vm7, %v3503_v41, %v610_v32  ;;  %vm618_vm7 = vcmp.eq.f32.partialorder %v594_v24, inf }
 0x2cc   : > { %v3526_v55 = vpop.permute.xlu0 %422  ;;  %2590 = vrsqrt.f32 %v3523_v48  ;;  %v615_v39 = vsel %vm613_vm8, %v614_v52, %v612_v20  ;;  %v3554_v32 = vadd.f32 %v580_v53, %v564_v35  ;;  %v621_v49 = vand.u32 2147483648, %v594_v24 }
 0x2cd   : > { %2501 = vset.pattern.permute.xlu1 %v2755_v16  ;;  %2592 = vrsqrt.f32 %v3521_v4  ;;  %v891_v14 = vmul.f32 %v791_v54, %v791_v54  ;;  %vm948_vm8 = vcmp.eq.f32.partialorder %v3523_v48, 0.0 }
 0x2ce   : > { %530 = vperm.xlu1 %2501, %v3334_v60  }
 0x2cf   : > { %v815_v15 = vpop.permute.xlu1 %814 }
 0x2d0   : > { %v875_v13 = vsub.f32 %v815_v15, %v3501_v56  ;;  %v3538_v40 = vpop.permute.xlu0 %434 }
 0x2d2   : > { %v2587_v50 = vpop.eup %2586  ;;  %v907_v19 = vmul.f32 %v875_v13, %v875_v13  ;;  %2502 = vset.pattern.permute.xlu1 %v2754_v8 }
 0x2d3   : > { %v938_v23 = vmul.f32 %v2587_v50, %v921_v0  ;;  %774 = vperm.xlu1 %2502, %v3334_v60   ;;  %v565_v50 = vmul.f32 %v465_v28, %v465_v28 }
 0x2d4   : > { %v3546_v58 = vadd.f32 %v907_v19, %v891_v14  ;;  %v735_v47 = vpop.permute.xlu1 %734  ;;  %v3548_v26 = vpop.permute.xlu0 %446  ;;  %v949_v19 = vand.u32 2147483648, %v3523_v48 }
 0x2d5   : > { %v2589_v36 = vpop.eup %2588  ;;  %v940_v17 = vsel %vm939_vm9, %v921_v0, %v938_v23  ;;  %v792_v51 = vsub.f32 %v735_v47, %v3493_v29  ;;  %vm620_vm9 = vcmp.eq.f32.partialorder %v594_v24, 0.0 }
 0x2d6   : > { %v943_v41 = vsel %vm941_vm5, %v942_v30, %v940_v17  ;;  %v617_v54 = vmul.f32 %v2589_v36, %v594_v24  ;;  %2594 = vrsqrt.f32 %v3546_v58  ;;  %v2591_v12 = vpop.eup %2590  ;;  %vm946_vm5 = vcmp.eq.f32.partialorder %v3523_v48, inf }
 0x2d7   : > { %v1049_v60 = vsub.f32 %v615_v39, %v943_v41  ;;  %2504 = vset.pattern.permute.xlu1 %v2753_v5  ;;  %v2593_v0 = vpop.eup %2592  ;;  %v945_v13 = vmul.f32 %v2591_v12, %v3523_v48  ;;  %2596 = vrsqrt.f32 %v3554_v32  ;;  %v892_v17 = vmul.f32 %v792_v51, %v792_v51 }
 0x2d8   : > { %v619_v15 = vsel %vm618_vm7, %v594_v24, %v617_v54  ;;  %450 = vperm.xlu1 %2504, %v3380_v57   ;;  %v624_v30 = vmul.f32 %v2593_v0, %v3521_v4  ;;  %vm378_vm7 = vcmp.lt.f32.partialorder %v3386_v10, %v3395_v1 }
 0x2d9   : > { %v1065_v18 = vand.u32 2147483647, %v1049_v60  ;;  %v622_v14 = vsel %vm620_vm9, %v621_v49, %v619_v15  ;;  %v947_v23 = vsel %vm946_vm5, %v3523_v48, %v945_v13  ;;  %vm625_vm9 = vcmp.eq.f32.partialorder %v3521_v4, inf }
 0x2da   : > { %v495_v20 = vpop.permute.xlu1 %494  ;;  %v819_v35 = vpop.permute.xlu0 %818  ;;  %v950_v47 = vsel %vm948_vm8, %v949_v19, %v947_v23  ;;  %v626_v0 = vsel %vm625_vm9, %v3521_v4, %v624_v30  ;;  %vm953_vm5 = vcmp.eq.f32.partialorder %v3546_v58, inf  ;;  %vm627_vm8 = vcmp.eq.f32.partialorder %v3521_v4, 0.0 }
 0x2db   : > { %v1081_v52 = vsel %vm377_vm10, %v1065_v18, 0.0  ;;  %v549_v24 = vsub.f32 %v495_v20, %v3475_v63  ;;  %v876_v53 = vsub.f32 %v819_v35, %v3501_v56  ;;  %v1050_v36 = vsub.f32 %v622_v14, %v950_v47 }
 0x2dc   : > { %2505 = vset.pattern.permute.xlu1 %v2755_v16  ;;  %v628_v16 = vand.u32 2147483648, %v3521_v4  ;;  %v956_v14 = vand.u32 2147483648, %v3546_v58  ;;  %v466_v20 = vsub.f32 %v3477_v46, %v3483_v9  ;;  %vm955_vm9 = vcmp.eq.f32.partialorder %v3546_v58, 0.0 }
 0x2dd   : > { %v581_v28 = vmul.f32 %v549_v24, %v549_v24  ;;  %v908_v39 = vmul.f32 %v876_v53, %v876_v53  ;;  %534 = vperm.xlu1 %2505, %v3380_v57   ;;  %v1066_v48 = vand.u32 2147483647, %v1050_v36 }
 0x2de   : > { %v823_v41 = vpop.permute.xlu0 %822  ;;  %v566_v46 = vmul.f32 %v466_v20, %v466_v20 }
 0x2df   : > { %v3573_v54 = vadd.f32 %v581_v28, %v565_v50  ;;  %v3575_v60 = vadd.f32 %v908_v39, %v892_v17  ;;  %v739_v12 = vpop.permute.xlu1 %738  ;;  %v877_v49 = vsub.f32 %v823_v41, %v3501_v56  ;;  %v1082_v18 = vsel %vm378_vm7, %v1066_v48, 0.0 }
 0x2e0   : > { %v2595_v15 = vpop.eup %2594  ;;  %v793_v51 = vsub.f32 %v739_v12, %v3493_v29  ;;  %v1097_v50 = vadd.f32 %v1082_v18, %v1081_v52  ;;  %v629_v52 = vsel %vm627_vm8, %v628_v16, %v626_v0  ;;  %vm632_vm8 = vcmp.eq.f32.partialorder %v3554_v32, inf }
 0x2e1   : > { %v952_v13 = vmul.f32 %v2595_v15, %v3546_v58  ;;  %2598 = vrsqrt.f32 %v3573_v54  ;;  %2506 = vset.pattern.permute.xlu1 %v2756_v33  ;;  %v909_v53 = vmul.f32 %v877_v49, %v877_v49  ;;  %v551_v0 = vsub.f32 %v3488_v25, %v3475_v63 }
 0x2e2   : > { %2600 = vrsqrt.f32 %v3575_v60  ;;  %862 = vperm.xlu1 %2506, %v3380_v57   ;;  %v3592_v19 = vpop.permute.xlu0 %834  ;;  %v893_v24 = vmul.f32 %v793_v51, %v793_v51  ;;  %v2597_v57 = vpop.eup %2596  ;;  %vm960_vm6 = vcmp.eq.f32.partialorder %v3575_v60, inf  ;;  %vm641_vm3 = vcmp.eq.f32.partialorder %v3573_v54, 0.0 }
 0x2e3   : > { %v954_v35 = vsel %vm953_vm5, %v3546_v58, %v952_v13  ;;  %vm379_vm5 = vcmp.lt.f32.partialorder %v3397_v3, %v3395_v1  ;;  %v631_v58 = vmul.f32 %v2597_v57, %v3554_v32  ;;  %v635_v13 = vand.u32 2147483648, %v3554_v32 }
 0x2e4   : > { %v957_v23 = vsel %vm955_vm9, %v956_v14, %v954_v35  ;;  %v499_v30 = vpop.permute.xlu1 %498  ;;  %v3600_v17 = vadd.f32 %v909_v53, %v893_v24  ;;  %vm634_vm9 = vcmp.eq.f32.partialorder %v3554_v32, 0.0  ;;  %v583_v53 = vmul.f32 %v551_v0, %v551_v0 }
 0x2e5   : > { %v1051_v47 = vsub.f32 %v629_v52, %v957_v23  ;;  %v550_v36 = vsub.f32 %v499_v30, %v3475_v63  ;;  %v633_v49 = vsel %vm632_vm8, %v3554_v32, %v631_v58  ;;  %vm962_vm8 = vcmp.eq.f32.partialorder %v3575_v60, 0.0 }
 0x2e6   : > { %2507 = vset.pattern.permute.xlu1 %v2753_v5  ;;  %v3603_v4 = vpop.permute.xlu0 %846  ;;  %2602 = vrsqrt.f32 %v3600_v17  ;;  %v636_v23 = vsel %vm634_vm9, %v635_v13, %v633_v49  ;;  %vm967_vm9 = vcmp.eq.f32.partialorder %v3600_v17, inf }
 0x2e7   : > { %v1067_v28 = vand.u32 2147483647, %v1051_v47  ;;  %v582_v39 = vmul.f32 %v550_v36, %v550_v36  ;;  %454 = vperm.xlu1 %2507, %v3389_v62  }
 0x2e9   : > { %v1083_v41 = vsel %vm379_vm5, %v1067_v28, 0.0  ;;  %v3613_v48 = vadd.f32 %v582_v39, %v566_v46  ;;  %v827_v5 = vpop.permute.xlu1 %826  ;;  %v642_v28 = vand.u32 2147483648, %v3573_v54 }
 0x2ea   : > { %v1098_v12 = vadd.f32 %v1097_v50, %v1083_v41  ;;  %v3615_v15 = vpop.permute.xlu0 %858  ;;  %v878_v50 = vsub.f32 %v827_v5, %v3501_v56  ;;  %v970_v41 = vand.u32 2147483648, %v3600_v17 }
 0x2eb   : > { %v2599_v16 = vpop.eup %2598  ;;  %2509 = vset.pattern.permute.xlu1 %v2754_v8  ;;  %v963_v8 = vand.u32 2147483648, %v3575_v60  ;;  %2604 = vrsqrt.f32 %v3613_v48 }
 0x2ec   : > { %v2601_v51 = vpop.eup %2600  ;;  %782 = vperm.xlu1 %2509, %v3389_v62   ;;  %v638_v20 = vmul.f32 %v2599_v16, %v3573_v54 }
 0x2ed   : > { %v959_v18 = vmul.f32 %v2601_v51, %v3575_v60 }
 0x2ee   : > { %v419_v14 = vpop.permute.xlu1 %418 }
 0x2ef   : > { %v961_v35 = vsel %vm960_vm6, %v3575_v60, %v959_v18  ;;  %v467_v52 = vsub.f32 %v419_v14, %v3483_v9  ;;  %v743_v25 = vpop.permute.xlu0 %742  ;;  %vm639_vm6 = vcmp.eq.f32.partialorder %v3573_v54, inf  ;;  %v910_v60 = vmul.f32 %v878_v50, %v878_v50 }
 0x2f0   : > { %v964_v24 = vsel %vm962_vm8, %v963_v8, %v961_v35  ;;  %v794_v32 = vsub.f32 %v743_v25, %v3493_v29  ;;  %2510 = vset.pattern.permute.xlu1 %v2756_v33  ;;  %v2603_v36 = vpop.eup %2602  ;;  %v640_v46 = vsel %vm639_vm6, %v3573_v54, %v638_v20  ;;  %vm969_vm8 = vcmp.eq.f32.partialorder %v3600_v17, 0.0 }
 0x2f1   : > { %v1052_v30 = vsub.f32 %v636_v23, %v964_v24  ;;  %v567_v47 = vmul.f32 %v467_v52, %v467_v52  ;;  %866 = vperm.xlu1 %2510, %v3389_v62   ;;  %v966_v33 = vmul.f32 %v2603_v36, %v3600_v17  ;;  %v643_v0 = vsel %vm641_vm3, %v642_v28, %v640_v46 }
 0x2f2   : > { %v894_v57 = vmul.f32 %v794_v32, %v794_v32  ;;  %vm381_vm6 = vcmp.lt.f32.partialorder %v3405_v37, %v3395_v1  ;;  %vm646_vm3 = vcmp.eq.f32.partialorder %v3613_v48, inf }
 0x2f3   : > { %v1068_v39 = vand.u32 2147483647, %v1052_v30  ;;  %v747_v58 = vpop.permute.xlu1 %746  ;;  %v968_v51 = vsel %vm967_vm9, %v3600_v17, %v966_v33  ;;  %v3650_v49 = vadd.f32 %v583_v53, %v567_v47  ;;  %v468_v17 = vsub.f32 %v3526_v55, %v3483_v9 }
 0x2f4   : > { %v926_v62 = vadd.f32 %v910_v60, %v894_v57  ;;  %v795_v5 = vsub.f32 %v747_v58, %v3493_v29  ;;  %v971_v13 = vsel %vm969_vm8, %v970_v41, %v968_v51  ;;  %v880_v53 = vsub.f32 %v3592_v19, %v3501_v56 }
 0x2f5   : > { %v1084_v16 = vsel %vm380_vm11, %v1068_v39, 0.0  ;;  %v1053_v8 = vsub.f32 %v643_v0, %v971_v13  ;;  %v2605_v35 = vpop.eup %2604  ;;  %v568_v32 = vmul.f32 %v468_v17, %v468_v17  ;;  %v649_v58 = vand.u32 2147483648, %v3613_v48 }
 0x2f6   : > { %v1099_v18 = vadd.f32 %v1098_v12, %v1084_v16  ;;  %2606 = vrsqrt.f32 %v926_v62  ;;  %v895_v12 = vmul.f32 %v795_v5, %v795_v5  ;;  %v645_v30 = vmul.f32 %v2605_v35, %v3613_v48 }
 0x2f7   : > { %v1069_v14 = vand.u32 2147483647, %v1053_v8  ;;  %2608 = vrsqrt.f32 %v3650_v49  ;;  %v912_v60 = vmul.f32 %v880_v53, %v880_v53  ;;  %vm974_vm9 = vcmp.eq.f32.partialorder %v926_v62, inf }
 0x2f8   : > { %v831_v50 = vpop.permute.xlu1 %830  ;;  %v647_v57 = vsel %vm646_vm3, %v3613_v48, %v645_v30  ;;  %v977_v19 = vand.u32 2147483648, %v926_v62  ;;  %vm648_vm8 = vcmp.eq.f32.partialorder %v3613_v48, 0.0  ;;  %vm976_vm4 = vcmp.eq.f32.partialorder %v926_v62, 0.0 }
 0x2f9   : > { %v879_v20 = vsub.f32 %v831_v50, %v3501_v56  ;;  %v1085_v54 = vsel %vm381_vm6, %v1069_v14, 0.0  ;;  %v650_v16 = vsel %vm648_vm8, %v649_v58, %v647_v57  ;;  %vm653_vm3 = vcmp.eq.f32.partialorder %v3650_v49, inf }
 0x2fa   : > { %v1100_v25 = vadd.f32 %v1099_v18, %v1085_v54  ;;  %v656_v48 = vand.u32 2147483648, %v3650_v49 }
 0x2fb   : > { %v911_v52 = vmul.f32 %v879_v20, %v879_v20 }
 0x2fd   : > { %v927_v23 = vadd.f32 %v911_v52, %v895_v12  ;;  %v507_v24 = vpop.permute.xlu1 %506  ;;  %v755_v52 = vpop.permute.xlu0 %754 }
 0x2fe   : > { %v552_v47 = vsub.f32 %v507_v24, %v3475_v63  ;;  %v797_v57 = vsub.f32 %v755_v52, %v3493_v29 }
 0x2ff   : > { %2610 = vrsqrt.f32 %v927_v23  ;;  %v984_v54 = vand.u32 2147483648, %v927_v23  ;;  %vm983_vm8 = vcmp.eq.f32.partialorder %v927_v23, 0.0 }
 0x300   : > { %v584_v55 = vmul.f32 %v552_v47, %v552_v47  ;;  %v2607_v36 = vpop.eup %2606 }
 0x301   : > { %v973_v46 = vmul.f32 %v2607_v36, %v926_v62  ;;  %v2609_v33 = vpop.eup %2608 }
 0x302   : > { %v3669_v28 = vadd.f32 %v584_v55, %v568_v32  ;;  %v751_v39 = vpop.permute.xlu1 %750  ;;  %v652_v18 = vmul.f32 %v2609_v33, %v3650_v49 }
 0x303   : > { %v796_v41 = vsub.f32 %v751_v39, %v3493_v29  ;;  %v975_v5 = vsel %vm974_vm9, %v926_v62, %v973_v46  ;;  %vm655_vm9 = vcmp.eq.f32.partialorder %v3650_v49, 0.0 }
 0x304   : > { %2612 = vrsqrt.f32 %v3669_v28  ;;  %v978_v51 = vsel %vm976_vm4, %v977_v19, %v975_v5  ;;  %v654_v17 = vsel %vm653_vm3, %v3650_v49, %v652_v18  ;;  %vm981_vm4 = vcmp.eq.f32.partialorder %v927_v23, inf }
 0x305   : > { %v896_v0 = vmul.f32 %v796_v41, %v796_v41  ;;  %v1054_v13 = vsub.f32 %v650_v16, %v978_v51  ;;  %v657_v30 = vsel %vm655_vm9, %v656_v48, %v654_v17  ;;  %v554_v49 = vsub.f32 %v3498_v43, %v3475_v63 }
 0x306   : > { %v897_v41 = vmul.f32 %v797_v57, %v797_v57  ;;  %vm660_vm3 = vcmp.eq.f32.partialorder %v3669_v28, inf  ;;  %v663_v51 = vand.u32 2147483648, %v3669_v28 }
 0x307   : > { %v928_v8 = vadd.f32 %v912_v60, %v896_v0  ;;  %v427_v50 = vpop.permute.xlu1 %426  ;;  %v1070_v14 = vand.u32 2147483647, %v1054_v13 }
 0x308   : > { %v469_v12 = vsub.f32 %v427_v50, %v3483_v9 }
 0x309   : > { %v2611_v20 = vpop.eup %2610  ;;  %2614 = vrsqrt.f32 %v928_v8  ;;  %v1086_v35 = vsel %vm382_vm12, %v1070_v14, 0.0  ;;  %vm988_vm9 = vcmp.eq.f32.partialorder %v928_v8, inf  ;;  %v991_v14 = vand.u32 2147483648, %v928_v8 }
 0x30a   : > { %v980_v62 = vmul.f32 %v2611_v20, %v927_v23  ;;  %v1101_v24 = vadd.f32 %v1100_v25, %v1086_v35  ;;  %v569_v46 = vmul.f32 %v469_v12, %v469_v12 }
 0x30c   : > { %v982_v32 = vsel %vm981_vm4, %v927_v23, %v980_v62  ;;  %v511_v53 = vpop.permute.xlu1 %510  ;;  %vm662_vm4 = vcmp.eq.f32.partialorder %v3669_v28, 0.0 }
 0x30d   : > { %v985_v47 = vsel %vm983_vm8, %v984_v54, %v982_v32  ;;  %v553_v55 = vsub.f32 %v511_v53, %v3475_v63  ;;  %vm990_vm8 = vcmp.eq.f32.partialorder %v928_v8, 0.0 }
 0x30e   : > { %v2613_v36 = vpop.eup %2612  ;;  %v1055_v60 = vsub.f32 %v657_v30, %v985_v47 }
 0x30f   : > { %v585_v39 = vmul.f32 %v553_v55, %v553_v55  ;;  %v659_v58 = vmul.f32 %v2613_v36, %v3669_v28  ;;  %v586_v55 = vmul.f32 %v554_v49, %v554_v49 }
 0x310   : > { %v1071_v33 = vand.u32 2147483647, %v1055_v60 }
 0x311   : > { %v3687_v19 = vadd.f32 %v585_v39, %v569_v46  ;;  %v839_v25 = vpop.permute.xlu1 %838  ;;  %v661_v50 = vsel %vm660_vm3, %v3669_v28, %v659_v58 }
 0x312   : > { %v881_v23 = vsub.f32 %v839_v25, %v3501_v56  ;;  %v1087_v5 = vsel %vm383_vm13, %v1071_v33, 0.0  ;;  %v664_v36 = vsel %vm662_vm4, %v663_v51, %v661_v50 }
 0x313   : > { %v2615_v16 = vpop.eup %2614  ;;  %2616 = vrsqrt.f32 %v3687_v19  ;;  %v1102_v13 = vadd.f32 %v1101_v24, %v1087_v5 }
 0x314   : > { %v987_v0 = vmul.f32 %v2615_v16, %v928_v8  ;;  %v913_v18 = vmul.f32 %v881_v23, %v881_v23  ;;  %v2340_v43 = vpop.f32.mrb[0].mxu0  ;;  %v471_v16 = vsub.f32 %v3538_v40, %v3483_v9 }
 0x315   : > { %v2033_v20 = vand.u32 2147483647, %v2340_v43  ;;  %v2366_v17 = vpop.f32.mrb[0].mxu1  ;;  %v1800_v48 = vpop.f32.mrb[1].mxu0 }
 0x316   : > { %v989_v62 = vsel %vm988_vm9, %v928_v8, %v987_v0  ;;  %v3700_v35 = vadd.f32 %v913_v18, %v897_v41  ;;  %v2090_v54 = vand.u32 2147483647, %v2366_v17  ;;  %v431_v12 = vpop.permute.xlu1 %430  ;;  %v2032_v52 = vand.u32 2147483647, %v1800_v48  ;;  %v1953_v32 = vpop.f32.mrb[1].mxu1 }
 0x317   : > { %v992_v53 = vsel %vm990_vm8, %v991_v14, %v989_v62  ;;  %v2049_v30 = vsel %vm378_vm7, %v2033_v20, 0.0  ;;  %v470_v24 = vsub.f32 %v431_v12, %v3483_v9  ;;  %v2089_v47 = vand.u32 2147483647, %v1953_v32 }
 0x318   : > { %2618 = vrsqrt.f32 %v3700_v35  ;;  %v2106_v8 = vsel %vm378_vm7, %v2090_v54, 0.0  ;;  %v2048_v57 = vsel %vm377_vm10, %v2032_v52, 0.0  ;;  %v1056_v58 = vsub.f32 %v664_v36, %v992_v53 }
 0x319   : > { %v570_v60 = vmul.f32 %v470_v24, %v470_v24  ;;  %v2105_v46 = vsel %vm377_vm10, %v2089_v47, 0.0  ;;  %v2064_v39 = vadd.f32 %v2049_v30, %v2048_v57  ;;  %v571_v53 = vmul.f32 %v471_v16, %v471_v16 }
 0x31a   : > { %v2121_v33 = vadd.f32 %v2106_v8, %v2105_v46  ;;  %v1072_v23 = vand.u32 2147483647, %v1056_v58  ;;  %vm667_vm10 = vcmp.eq.f32.partialorder %v3687_v19, inf  ;;  %vm997_vm7 = vcmp.eq.f32.partialorder %v3700_v35, 0.0 }
 0x31b   : > { %v759_v28 = vpop.permute.xlu1 %758  ;;  %v3718_v25 = vadd.f32 %v586_v55, %v570_v60  ;;  %v998_v55 = vand.u32 2147483648, %v3700_v35  ;;  %v883_v16 = vsub.f32 %v3603_v4, %v3501_v56  ;;  %vm4034_vm9 = vcmp.lt.f32.partialorder %v3449_v27, %v3395_v1 }
 0x31c   : > { %v2343_v49 = vpop.f32.mrb[2].mxu0  ;;  %v798_v21 = vsub.f32 %v759_v28, %v3493_v29  ;;  %v1088_v14 = vsel %vm384_vm14, %v1072_v23, 0.0  ;;  %v670_v28 = vand.u32 2147483648, %v3687_v19  ;;  %vm4035_vm8 = vmmov %vm4034_vm9 }
 0x31d   : > { %v2369_v41 = vpop.f32.mrb[2].mxu1  ;;  %v1810_v10 = vpop.f32.mrb[3].mxu0  ;;  %v2035_v51 = vand.u32 2147483647, %v2343_v49  ;;  %2620 = vrsqrt.f32 %v3718_v25  ;;  %v3733_v48 = vadd.f32 %v1102_v13, %v1088_v14 }
 0x31e   : > { %v2617_v5 = vpop.eup %2616  ;;  %v2092_v0 = vand.u32 2147483647, %v2369_v41  ;;  %v1963_v18 = vpop.f32.mrb[3].mxu1  ;;  %v2034_v43 = vand.u32 2147483647, %v1810_v10  ;;  %v898_v24 = vmul.f32 %v798_v21, %v798_v21 }
 0x31f   : > { %v2091_v50 = vand.u32 2147483647, %v1963_v18  ;;  %v2051_v20 = vsel %vm380_vm11, %v2035_v51, 0.0  ;;  %v666_v62 = vmul.f32 %v2617_v5, %v3687_v19 }
 0x320   : > { %v2108_v40 = vsel %vm380_vm11, %v2092_v0, 0.0  ;;  %v843_v17 = vpop.permute.xlu1 %842  ;;  %v2050_v54 = vsel %vm379_vm5, %v2034_v43, 0.0  ;;  %vm995_vm11 = vcmp.eq.f32.partialorder %v3700_v35, inf }
 0x321   : > { %v2107_v12 = vsel %vm379_vm5, %v2091_v50, 0.0  ;;  %v882_v52 = vsub.f32 %v843_v17, %v3501_v56  ;;  %v2065_v31 = vadd.f32 %v2064_v39, %v2050_v54  ;;  %v668_v60 = vsel %vm667_vm10, %v3687_v19, %v666_v62  ;;  %v767_v62 = vpop.permute.xlu0 %766 }
 0x322   : > { %v2619_v32 = vpop.eup %2618  ;;  %v2122_v30 = vadd.f32 %v2121_v33, %v2107_v12  ;;  %vm669_vm5 = vcmp.eq.f32.partialorder %v3687_v19, 0.0  ;;  %v915_v19 = vmul.f32 %v883_v16, %v883_v16  ;;  %vm4036_vm10 = vcmp.lt.f32.partialorder %v3447_v42, %v3395_v1 }
 0x323   : > { %v994_v13 = vmul.f32 %v2619_v32, %v3700_v35  ;;  %v914_v47 = vmul.f32 %v882_v52, %v882_v52  ;;  %v2066_v36 = vadd.f32 %v2065_v31, %v2051_v20  ;;  %v671_v21 = vsel %vm669_vm5, %v670_v28, %v668_v60 }
 0x324   : > { %v2346_v3 = vpop.f32.mrb[4].mxu0  ;;  %v2123_v8 = vadd.f32 %v2122_v30, %v2108_v40 }
 0x325   : > { %v996_v57 = vsel %vm995_vm11, %v3700_v35, %v994_v13  ;;  %v3750_v46 = vadd.f32 %v914_v47, %v898_v24  ;;  %v519_v39 = vpop.permute.xlu1 %518  ;;  %v2037_v33 = vand.u32 2147483647, %v2346_v3  ;;  %v2372_v58 = vpop.f32.mrb[4].mxu1  ;;  %v800_v3 = vsub.f32 %v767_v62, %v3493_v29  ;;  %vm4037_vm11 = vmmov %vm4036_vm10 }
 0x326   : > { %v555_v49 = vsub.f32 %v519_v39, %v3475_v63  ;;  %v2094_v23 = vand.u32 2147483647, %v2372_v58  ;;  %v1820_v41 = vpop.f32.mrb[5].mxu0  ;;  %v1973_v10 = vpop.f32.mrb[5].mxu1  ;;  %v999_v5 = vsel %vm997_vm7, %v998_v55, %v996_v57 }
 0x327   : > { %2622 = vrsqrt.f32 %v3750_v46  ;;  %v2053_v0 = vsel %vm382_vm12, %v2037_v33, 0.0  ;;  %v2036_v43 = vand.u32 2147483647, %v1820_v41  ;;  %v2093_v35 = vand.u32 2147483647, %v1973_v10  ;;  %v2621_v14 = vpop.eup %2620 }
 0x328   : > { %v587_v51 = vmul.f32 %v555_v49, %v555_v49  ;;  %v2110_v18 = vsel %vm382_vm12, %v2094_v23, 0.0  ;;  %v1057_v50 = vsub.f32 %v671_v21, %v999_v5  ;;  %vm674_vm12 = vcmp.eq.f32.partialorder %v3718_v25, inf }
 0x329   : > { %v2052_v40 = vsel %vm381_vm6, %v2036_v43, 0.0  ;;  %v2109_v17 = vsel %vm381_vm6, %v2093_v35, 0.0  ;;  %v673_v12 = vmul.f32 %v2621_v14, %v3718_v25  ;;  %vm676_vm6 = vcmp.eq.f32.partialorder %v3718_v25, 0.0 }
 0x32a   : > { %v3766_v20 = vadd.f32 %v587_v51, %v571_v53  ;;  %v763_v4 = vpop.permute.xlu1 %762  ;;  %v2067_v54 = vadd.f32 %v2066_v36, %v2052_v40  ;;  %v2124_v52 = vadd.f32 %v2123_v8, %v2109_v17  ;;  %v1073_v30 = vand.u32 2147483647, %v1057_v50 }
 0x32b   : > { %v799_v34 = vsub.f32 %v763_v4, %v3493_v29  ;;  %v675_v23 = vsel %vm674_vm12, %v3718_v25, %v673_v12  ;;  %v677_v41 = vand.u32 2147483648, %v3718_v25  ;;  %v1005_v51 = vand.u32 2147483648, %v3750_v46 }
 0x32c   : > { %2624 = vrsqrt.f32 %v3766_v20  ;;  %v2068_v37 = vadd.f32 %v2067_v54, %v2053_v0  ;;  %v2125_v33 = vadd.f32 %v2124_v52, %v2110_v18  ;;  %v1089_v28 = vsel %vm385_vm15, %v1073_v30, 0.0 }
 0x32d   : > { %v899_v32 = vmul.f32 %v799_v34, %v799_v34  ;;  %v2349_v53 = vpop.f32.mrb[6].mxu0  ;;  %v2375_v31 = vpop.f32.mrb[6].mxu1  ;;  %v1104_v21 = vadd.f32 %v3733_v48, %v1089_v28  ;;  %vm1004_vm3 = vcmp.eq.f32.partialorder %v3750_v46, 0.0  ;;  %v678_v4 = vsel %vm676_vm6, %v677_v41, %v675_v23 }
 0x32e   : > { %v2039_v13 = vand.u32 2147483647, %v2349_v53  ;;  %v2096_v24 = vand.u32 2147483647, %v2375_v31  ;;  %v1830_v47 = vpop.f32.mrb[7].mxu0  ;;  %v1983_v55 = vpop.f32.mrb[7].mxu1  ;;  %v557_v48 = vsub.f32 %v3507_v6, %v3475_v63  ;;  %v900_v6 = vmul.f32 %v800_v3, %v800_v3 }
 0x32f   : > { %v3779_v60 = vadd.f32 %v915_v19, %v899_v32  ;;  %v2038_v57 = vand.u32 2147483647, %v1830_v47  ;;  %v2095_v39 = vand.u32 2147483647, %v1983_v55  ;;  %v439_v36 = vpop.permute.xlu1 %438  ;;  %v684_v28 = vand.u32 2147483648, %v3766_v20 }
 0x330   : > { %v2055_v8 = vsel %vm384_vm14, %v2039_v13, 0.0  ;;  %v2112_v58 = vsel %vm384_vm14, %v2096_v24, 0.0  ;;  %vm1002_vm14 = vcmp.eq.f32.partialorder %v3750_v46, inf  ;;  %v472_v18 = vsub.f32 %v439_v36, %v3483_v9 }
 0x331   : > { %v2623_v49 = vpop.eup %2622  ;;  %2626 = vrsqrt.f32 %v3779_v60  ;;  %v2054_v10 = vsel %vm383_vm13, %v2038_v57, 0.0  ;;  %v2111_v16 = vsel %vm383_vm13, %v2095_v39, 0.0  ;;  %vm681_vm13 = vcmp.eq.f32.partialorder %v3766_v20, inf }
 0x332   : > { %v1001_v2 = vmul.f32 %v2623_v49, %v3750_v46  ;;  %v2069_v5 = vadd.f32 %v2068_v37, %v2054_v10  ;;  %v2126_v0 = vadd.f32 %v2125_v33, %v2111_v16  ;;  %v572_v53 = vmul.f32 %v472_v18, %v472_v18 }
 0x333   : > { %vm1009_vm4 = vcmp.eq.f32.partialorder %v3779_v60, inf  ;;  %v1012_v23 = vand.u32 2147483648, %v3779_v60 }
 0x334   : > { %v1003_v43 = vsel %vm1002_vm14, %v3750_v46, %v1001_v2  ;;  %v523_v35 = vpop.permute.xlu1 %522  ;;  %v2352_v50 = vpop.f32.mrb[8].mxu0  ;;  %v2070_v14 = vadd.f32 %v2069_v5, %v2055_v8  ;;  %v2127_v34 = vadd.f32 %v2126_v0, %v2112_v58 }
 0x335   : > { %v556_v11 = vsub.f32 %v523_v35, %v3475_v63  ;;  %v2041_v19 = vand.u32 2147483647, %v2352_v50  ;;  %v2378_v40 = vpop.f32.mrb[8].mxu1  ;;  %v1840_v17 = vpop.f32.mrb[9].mxu0  ;;  %v1006_v62 = vsel %vm1004_vm3, %v1005_v51, %v1003_v43 }
 0x336   : > { %v2625_v54 = vpop.eup %2624  ;;  %v2098_v12 = vand.u32 2147483647, %v2378_v40  ;;  %v2040_v52 = vand.u32 2147483647, %v1840_v17  ;;  %v1993_v46 = vpop.f32.mrb[9].mxu1  ;;  %v1058_v32 = vsub.f32 %v678_v4, %v1006_v62 }
 0x337   : > { %v588_v31 = vmul.f32 %v556_v11, %v556_v11  ;;  %v2057_v25 = vsel %vm386_vm0, %v2041_v19, 0.0  ;;  %v2097_v30 = vand.u32 2147483647, %v1993_v46  ;;  %v680_v37 = vmul.f32 %v2625_v54, %v3766_v20 }
 0x338   : > { %v2114_v13 = vsel %vm386_vm0, %v2098_v12, 0.0  ;;  %v2056_v24 = vsel %vm385_vm15, %v2040_v52, 0.0  ;;  %v1074_v47 = vand.u32 2147483647, %v1058_v32  ;;  %v589_v32 = vmul.f32 %v557_v48, %v557_v48 }
 0x339   : > { %v3824_v55 = vadd.f32 %v588_v31, %v572_v53  ;;  %v2071_v57 = vadd.f32 %v2070_v14, %v2056_v24  ;;  %v2113_v39 = vsel %vm385_vm15, %v2097_v30, 0.0  ;;  %v851_v33 = vpop.permute.xlu1 %850  ;;  %v682_v38 = vsel %vm681_vm13, %v3766_v20, %v680_v37 }
 0x33a   : > { %v2128_v36 = vadd.f32 %v2127_v34, %v2113_v39  ;;  %v884_v8 = vsub.f32 %v851_v33, %v3501_v56  ;;  %v1090_v3 = vsel %vm386_vm0, %v1074_v47, 0.0  ;;  %vm1011_vm15 = vcmp.eq.f32.partialorder %v3779_v60, 0.0 }
 0x33b   : > { %v2627_v58 = vpop.eup %2626  ;;  %2628 = vrsqrt.f32 %v3824_v55  ;;  %v2072_v49 = vadd.f32 %v2071_v57, %v2057_v25  ;;  %v1105_v0 = vadd.f32 %v1104_v21, %v1090_v3  ;;  %vm683_vm0 = vcmp.eq.f32.partialorder %v3766_v20, 0.0 }
 0x33c   : > { %v1008_v22 = vmul.f32 %v2627_v58, %v3779_v60  ;;  %v916_v41 = vmul.f32 %v884_v8, %v884_v8  ;;  %v2355_v10 = vpop.f32.mrb[10].mxu0  ;;  %v2129_v2 = vadd.f32 %v2128_v36, %v2114_v13  ;;  %v685_v12 = vsel %vm683_vm0, %v684_v28, %v682_v38 }
 0x33d   : > { %v2043_v5 = vand.u32 2147483647, %v2355_v10  ;;  %v2381_v16 = vpop.f32.mrb[10].mxu1  ;;  %v1850_v51 = vpop.f32.mrb[11].mxu0  ;;  %vm688_vm7 = vcmp.eq.f32.partialorder %v3824_v55, inf  ;;  %vm690_vm12 = vcmp.eq.f32.partialorder %v3824_v55, 0.0 }
 0x33e   : > { %v3843_v18 = vadd.f32 %v916_v41, %v900_v6  ;;  %v2100_v43 = vand.u32 2147483647, %v2381_v16  ;;  %v443_v35 = vpop.permute.xlu1 %442  ;;  %v2042_v50 = vand.u32 2147483647, %v1850_v51  ;;  %v2003_v14 = vpop.f32.mrb[11].mxu1  ;;  %v1010_v4 = vsel %vm1009_vm4, %v3779_v60, %v1008_v22 }
 0x33f   : > { %v2059_v11 = vsel %vm388_vm2, %v2043_v5, 0.0  ;;  %v473_v19 = vsub.f32 %v443_v35, %v3483_v9  ;;  %v2099_v40 = vand.u32 2147483647, %v2003_v14  ;;  %v1013_v17 = vsel %vm1011_vm15, %v1012_v23, %v1010_v4  ;;  %vm4038_vm15 = vmmov %vm4036_vm10 }
 0x340   : > { %2630 = vrsqrt.f32 %v3843_v18  ;;  %v2116_v21 = vsel %vm388_vm2, %v2100_v43, 0.0  ;;  %v2058_v34 = vsel %vm387_vm1, %v2042_v50, 0.0  ;;  %v1059_v46 = vsub.f32 %v685_v12, %v1013_v17 }
 0x341   : > { %v573_v60 = vmul.f32 %v473_v19, %v473_v19  ;;  %v2073_v62 = vadd.f32 %v2072_v49, %v2058_v34  ;;  %v2115_v54 = vsel %vm387_vm1, %v2099_v40, 0.0  ;;  %v474_v5 = vsub.f32 %v3548_v26, %v3483_v9 }
 0x342   : > { %v2130_v52 = vadd.f32 %v2129_v2, %v2115_v54  ;;  %v1075_v8 = vand.u32 2147483647, %v1059_v46  ;;  %vm1016_vm5 = vcmp.eq.f32.partialorder %v3843_v18, inf  ;;  %v1019_v26 = vand.u32 2147483648, %v3843_v18 }
 0x343   : > { %v771_v53 = vpop.permute.xlu1 %770  ;;  %v2074_v31 = vadd.f32 %v2073_v62, %v2059_v11  ;;  %v3863_v6 = vadd.f32 %v589_v32, %v573_v60  ;;  %v691_v40 = vand.u32 2147483648, %v3824_v55  ;;  %v574_v60 = vmul.f32 %v474_v5, %v474_v5 }
 0x344   : > { %v2358_v25 = vpop.f32.mrb[12].mxu0  ;;  %v2384_v30 = vpop.f32.mrb[12].mxu1  ;;  %v2131_v13 = vadd.f32 %v2130_v52, %v2116_v21  ;;  %v801_v39 = vsub.f32 %v771_v53, %v3493_v29  ;;  %v1091_v51 = vsel %vm387_vm1, %v1075_v8, 0.0  ;;  %vm1018_vm1 = vcmp.eq.f32.partialorder %v3843_v18, 0.0 }
 0x345   : > { %v2629_v24 = vpop.eup %2628  ;;  %v2045_v47 = vand.u32 2147483647, %v2358_v25  ;;  %v2102_v20 = vand.u32 2147483647, %v2384_v30  ;;  %v1860_v37 = vpop.f32.mrb[13].mxu0  ;;  %2632 = vrsqrt.f32 %v3863_v6  ;;  %v1106_v4 = vadd.f32 %v1105_v0, %v1091_v51 }
 0x346   : > { %v2013_v57 = vpop.f32.mrb[13].mxu1  ;;  %v2044_v33 = vand.u32 2147483647, %v1860_v37  ;;  %v687_v58 = vmul.f32 %v2629_v24, %v3824_v55  ;;  %v901_v16 = vmul.f32 %v801_v39, %v801_v39  ;;  %v886_v0 = vsub.f32 %v3615_v15, %v3501_v56 }
 0x347   : > { %v2101_v36 = vand.u32 2147483647, %v2013_v57  ;;  %v2061_v48 = vsel %vm4034_vm9, %v2045_v47, 0.0  ;;  %v2118_v3 = vsel %vm4035_vm8, %v2102_v20, 0.0  ;;  %v779_v47 = vpop.permute.xlu0 %778  ;;  %vm695_vm6 = vcmp.eq.f32.partialorder %v3863_v6, inf }
 0x348   : > { %v2060_v28 = vsel %vm4036_vm10, %v2044_v33, 0.0  ;;  %v855_v22 = vpop.permute.xlu1 %854  ;;  %v689_v14 = vsel %vm688_vm7, %v3824_v55, %v687_v58  ;;  %v918_v53 = vmul.f32 %v886_v0, %v886_v0  ;;  %v698_v61 = vand.u32 2147483648, %v3863_v6 }
 0x349   : > { %v2117_v49 = vsel %vm4037_vm11, %v2101_v36, 0.0  ;;  %v2075_v23 = vadd.f32 %v2074_v31, %v2060_v28  ;;  %v885_v10 = vsub.f32 %v855_v22, %v3501_v56  ;;  %v692_v34 = vsel %vm690_vm12, %v691_v40, %v689_v14 }
 0x34a   : > { %v2132_v41 = vadd.f32 %v2131_v13, %v2117_v49  ;;  %v2631_v2 = vpop.eup %2630  ;;  %v803_v36 = vsub.f32 %v779_v47, %v3493_v29  ;;  %vm697_vm14 = vcmp.eq.f32.partialorder %v3863_v6, 0.0  ;;  %vm4039_vm9 = vcmp.lt.f32.partialorder %v3459_v44, %v3395_v1 }
 0x34b   : > { %v1015_v38 = vmul.f32 %v2631_v2, %v3843_v18  ;;  %v917_v43 = vmul.f32 %v885_v10, %v885_v10  ;;  %v3888_v35 = vadd.f32 %v2075_v23, %v2061_v48  ;;  %vm4040_vm8 = vmmov %vm4039_vm9  ;;  %vm4041_vm10 = vcmp.lt.f32.partialorder %v3457_v45, %v3395_v1 }
 0x34c   : > { %v3890_v50 = vadd.f32 %v2132_v41, %v2118_v3  ;;  %v539_v3 = vpop.permute.xlu0 %538  ;;  %v903_v10 = vmul.f32 %v803_v36, %v803_v36  ;;  %vm4042_vm11 = vmmov %vm4041_vm10 }
 0x34d   : > { %v933_v11 = vadd.f32 %v917_v43, %v901_v16  ;;  %v531_v19 = vpop.permute.xlu1 %530  ;;  %v1017_v7 = vsel %vm1016_vm5, %v3843_v18, %v1015_v38  ;;  %v560_v2 = vsub.f32 %v539_v3, %v3475_v63  ;;  %vm4043_vm5 = vcmp.lt.f32.partialorder %v3449_v27, %v3395_v1 }
 0x34e   : > { %v558_v17 = vsub.f32 %v531_v19, %v3475_v63  ;;  %v1020_v21 = vsel %vm1018_vm1, %v1019_v26, %v1017_v7 }
 0x34f   : > { %2634 = vrsqrt.f32 %v933_v11  ;;  %v1060_v54 = vsub.f32 %v692_v34, %v1020_v21  ;;  %v2633_v32 = vpop.eup %2632  ;;  %v1026_v39 = vand.u32 2147483648, %v933_v11  ;;  %vm1025_vm3 = vcmp.eq.f32.partialorder %v933_v11, 0.0 }
 0x350   : > { %v590_v62 = vmul.f32 %v558_v17, %v558_v17  ;;  %v694_v25 = vmul.f32 %v2633_v32, %v3863_v6 }
 0x351   : > { %v1076_v46 = vand.u32 2147483647, %v1060_v54 }
 0x352   : > { %v3902_v12 = vadd.f32 %v590_v62, %v574_v60  ;;  %v775_v52 = vpop.permute.xlu1 %774  ;;  %v696_v37 = vsel %vm695_vm6, %v3863_v6, %v694_v25 }
 0x353   : > { %v802_v18 = vsub.f32 %v775_v52, %v3493_v29  ;;  %v1092_v31 = vsel %vm388_vm2, %v1076_v46, 0.0  ;;  %vm1023_vm2 = vcmp.eq.f32.partialorder %v933_v11, inf  ;;  %v699_v58 = vsel %vm697_vm14, %v698_v61, %v696_v37  ;;  %vm4044_vm14 = vmmov %vm4041_vm10 }
 0x354   : > { %2636 = vrsqrt.f32 %v3902_v12  ;;  %v1107_v30 = vadd.f32 %v1106_v4, %v1092_v31  ;;  %vm702_vm13 = vcmp.eq.f32.partialorder %v3902_v12, inf  ;;  %vm704_vm4 = vcmp.eq.f32.partialorder %v3902_v12, 0.0 }
 0x355   : > { %v902_v55 = vmul.f32 %v802_v18, %v802_v18  ;;  %v592_v37 = vmul.f32 %v560_v2, %v560_v2 }
 0x357   : > { %v3910_v13 = vadd.f32 %v918_v53, %v902_v55  ;;  %v451_v15 = vpop.permute.xlu1 %450 }
 0x358   : > { %v475_v57 = vsub.f32 %v451_v15, %v3483_v9 }
 0x359   : > { %v2635_v24 = vpop.eup %2634  ;;  %2638 = vrsqrt.f32 %v3910_v13  ;;  %vm1030_vm0 = vcmp.eq.f32.partialorder %v3910_v13, inf  ;;  %v1033_v62 = vand.u32 2147483648, %v3910_v13  ;;  %vm1032_vm7 = vcmp.eq.f32.partialorder %v3910_v13, 0.0 }
 0x35a   : > { %v1022_v20 = vmul.f32 %v2635_v24, %v933_v11  ;;  %v575_v23 = vmul.f32 %v475_v57, %v475_v57 }
 0x35c   : > { %v535_v33 = vpop.permute.xlu1 %534  ;;  %v1024_v8 = vsel %vm1023_vm2, %v933_v11, %v1022_v20  ;;  %v705_v11 = vand.u32 2147483648, %v3902_v12 }
 0x35d   : > { %v559_v48 = vsub.f32 %v535_v33, %v3475_v63  ;;  %v1027_v28 = vsel %vm1025_vm3, %v1026_v39, %v1024_v8 }
 0x35e   : > { %v2637_v49 = vpop.eup %2636  ;;  %v1061_v22 = vsub.f32 %v699_v58, %v1027_v28 }
 0x35f   : > { %v591_v41 = vmul.f32 %v559_v48, %v559_v48  ;;  %v701_v6 = vmul.f32 %v2637_v49, %v3902_v12 }
 0x360   : > { %v1077_v5 = vand.u32 2147483647, %v1061_v22 }
 0x361   : > { %v3921_v16 = vadd.f32 %v591_v41, %v575_v23  ;;  %v863_v51 = vpop.permute.xlu1 %862  ;;  %v2361_v38 = vpop.f32.mrb[14].mxu0  ;;  %v703_v0 = vsel %vm702_vm13, %v3902_v12, %v701_v6 }
 0x362   : > { %v887_v43 = vsub.f32 %v863_v51, %v3501_v56  ;;  %v2047_v14 = vand.u32 2147483647, %v2361_v38  ;;  %v2387_v26 = vpop.f32.mrb[14].mxu1  ;;  %v1870_v4 = vpop.f32.mrb[15].mxu0  ;;  %v1093_v63 = vsel %vm4038_vm15, %v1077_v5, 0.0 }
 0x363   : > { %v2639_v19 = vpop.eup %2638  ;;  %2640 = vrsqrt.f32 %v3921_v16  ;;  %v2104_v40 = vand.u32 2147483647, %v2387_v26  ;;  %v2046_v7 = vand.u32 2147483647, %v1870_v4  ;;  %v2023_v17 = vpop.f32.mrb[15].mxu1  ;;  %v1108_v55 = vadd.f32 %v1107_v30, %v1093_v63 }
 0x364   : > { %v919_v21 = vmul.f32 %v887_v43, %v887_v43  ;;  %v2063_v34 = vsel %vm4039_vm9, %v2047_v14, 0.0  ;;  %v2103_v60 = vand.u32 2147483647, %v2023_v17  ;;  %v1029_v52 = vmul.f32 %v2639_v19, %v3910_v13 }
 0x365   : > { %v2120_v42 = vsel %vm4040_vm8, %v2104_v40, 0.0  ;;  %v2062_v54 = vsel %vm4041_vm10, %v2046_v7, 0.0  ;;  %vm709_vm1 = vcmp.eq.f32.partialorder %v3921_v16, inf  ;;  %vm711_vm2 = vcmp.eq.f32.partialorder %v3921_v16, 0.0 }
 0x366   : > { %v935_v46 = vadd.f32 %v919_v21, %v903_v10  ;;  %v2077_v32 = vadd.f32 %v3888_v35, %v2062_v54  ;;  %v2119_v18 = vsel %vm4042_vm11, %v2103_v60, 0.0  ;;  %v455_v53 = vpop.permute.xlu1 %454  ;;  %v1031_v15 = vsel %vm1030_vm0, %v3910_v13, %v1029_v52  ;;  %vm4045_vm0 = vmmov %vm4040_vm8 }
 0x367   : > { %v2134_v31 = vadd.f32 %v3890_v50, %v2119_v18  ;;  %v476_v25 = vsub.f32 %v455_v53, %v3483_v9  ;;  %v706_v35 = vsel %vm704_vm4, %v705_v11, %v703_v0  ;;  %v1034_v47 = vsel %vm1032_vm7, %v1033_v62, %v1031_v15 }
 0x368   : > { %2642 = vrsqrt.f32 %v935_v46  ;;  %v2078_v24 = vadd.f32 %v2077_v32, %v2063_v34  ;;  %v1062_v57 = vsub.f32 %v706_v35, %v1034_v47  ;;  %vm1037_vm12 = vcmp.eq.f32.partialorder %v935_v46, inf }
 0x369   : > { %v576_v20 = vmul.f32 %v476_v25, %v476_v25  ;;  %v2135_v30 = vadd.f32 %v2134_v31, %v2120_v42  ;;  %v1040_v27 = vand.u32 2147483648, %v935_v46  ;;  %vm1039_vm6 = vcmp.eq.f32.partialorder %v935_v46, 0.0 }
 0x36a   : > { %2079 = vadd.xlane.f32.xlu1 %v2078_v24  ;;  %v1078_v61 = vand.u32 2147483647, %v1062_v57  ;;  %vm2147_vm9 = vcmp.eq.s32.totalorder %v3213_v59, 1  ;;  %vm2146_vm8 = vcmp.eq.s32.totalorder %v3213_v59, 0 }
 0x36b   : > { %v783_v50 = vpop.permute.xlu1 %782  ;;  %v608_v39 = vadd.f32 %v592_v37, %v576_v20  ;;  %v2148_v37 = vstv %s2390_s15 }
 0x36c   : > { %v1094_v33 = vsel %vm4043_vm5, %v1078_v61, 0.0  ;;  %v804_v13 = vsub.f32 %v783_v50, %v3493_v29  ;;  %v712_v29 = vand.u32 2147483648, %v3921_v16  ;;  %v2149_v57 = vsel %vm2147_vm9, %v2148_v37, 0.0 }
 0x36d   : > { %v2641_v9 = vpop.eup %2640  ;;  %v1109_v36 = vadd.f32 %v1108_v55, %v1094_v33  ;;  %2644 = vrsqrt.f32 %v608_v39  ;;  %vm716_vm3 = vcmp.eq.f32.partialorder %v608_v39, inf  ;;  %v719_v11 = vand.u32 2147483648, %v608_v39 }
 0x36e   : > { %v708_v12 = vmul.f32 %v2641_v9, %v3921_v16  ;;  %v904_v58 = vmul.f32 %v804_v13, %v804_v13  ;;  %vm718_vm4 = vcmp.eq.f32.partialorder %v608_v39, 0.0 }
 0x370   : > { %v867_v8 = vpop.permute.xlu1 %866  ;;  %v710_v22 = vsel %vm709_vm1, %v3921_v16, %v708_v12 }
 0x371   : > { %v888_v48 = vsub.f32 %v867_v8, %v3501_v56  ;;  %v713_v56 = vsel %vm711_vm2, %v712_v29, %v710_v22 }
 0x372   : > { %v2643_v3 = vpop.eup %2642 }
 0x373   : > { %v920_v28 = vmul.f32 %v888_v48, %v888_v48  ;;  %v1036_v49 = vmul.f32 %v2643_v3, %v935_v46 }
 0x375   : > { %v936_v23 = vadd.f32 %v920_v28, %v904_v58  ;;  %v1038_v41 = vsel %vm1037_vm12, %v935_v46, %v1036_v49 }
 0x376   : > { %v1041_v10 = vsel %vm1039_vm6, %v1040_v27, %v1038_v41 }
 0x377   : > { %2646 = vrsqrt.f32 %v936_v23  ;;  %v1063_v2 = vsub.f32 %v713_v56, %v1041_v10  ;;  %v2645_v51 = vpop.eup %2644  ;;  %vm1044_vm13 = vcmp.eq.f32.partialorder %v936_v23, inf  ;;  %v1047_v63 = vand.u32 2147483648, %v936_v23 }
 0x378   : > { %v715_v43 = vmul.f32 %v2645_v51, %v608_v39  ;;  %vm1046_vm15 = vcmp.eq.f32.partialorder %v936_v23, 0.0 }
 0x379   : > { %v1079_v5 = vand.u32 2147483647, %v1063_v2 }
 0x37a   : > { %v717_v26 = vsel %vm716_vm3, %v608_v39, %v715_v43 }
 0x37b   : > { %v1095_v38 = vsel %vm4044_vm14, %v1079_v5, 0.0  ;;  %v720_v19 = vsel %vm718_vm4, %v719_v11, %v717_v26 }
 0x37c   : > { %v1110_v6 = vadd.f32 %v1109_v36, %v1095_v38 }
 0x381   : > { %v2647_v14 = vpop.eup %2646 }
 0x382   : > { %v1043_v4 = vmul.f32 %v2647_v14, %v936_v23 }
 0x384   : > { %v1045_v16 = vsel %vm1044_vm13, %v936_v23, %v1043_v4 }
 0x385   : > { %v1048_v40 = vsel %vm1046_vm15, %v1047_v63, %v1045_v16 }
 0x386   : > { %v1064_v7 = vsub.f32 %v720_v19, %v1048_v40 }
 0x388   : > { %v1080_v17 = vand.u32 2147483647, %v1064_v7 }
 0x38a   : > { %v1096_v45 = vsel %vm4045_vm0, %v1080_v17, 0.0 }
 0x38b   : > { %v1111_v21 = vadd.f32 %v1110_v6, %v1096_v45 }
 0x38d   : > { %1112 = vadd.xlane.f32.xlu0 %v1111_v21 }
 0x391   : > { %2136 = vadd.xlane.f32.xlu0 %v2135_v30 }
 0x3f7   : > { %v2080_v34 = vpop.xlane.xlu1 %2079 }
 0x3f8   : > { %v2081_v60 = vrot.slane %v2080_v34, 4 }
 0x3fa   : > { %v2082_v62 = vadd.f32 %v2081_v60, %v2080_v34 }
 0x3fc   : > { %v2083_v42 = vrot.slane %v2082_v62, 2 }
 0x3fe   : > { %v2084_v46 = vadd.f32 %v2083_v42, %v2082_v62 }
 0x400   : > { %v2085_v25 = vrot.slane %v2084_v46, 1 }
 0x402   : > { %v2086_v35 = vadd.f32 %v2085_v25, %v2084_v46 }
 0x41a   : > { %v1113_v54 = vpop.xlane.xlu0 %1112 }
 0x41b   : > { %v1114_v0 = vrot.slane %v1113_v54, 4 }
 0x41d   : > { %v1115_v52 = vadd.f32 %v1114_v0, %v1113_v54 }
 0x41e   : > { %v2137_v32 = vpop.xlane.xlu0 %2136 }
 0x41f   : > { %v1116_v18 = vrot.slane %v1115_v52, 2  ;;  %v2138_v53 = vrot.slane %v2137_v32, 4 }
 0x421   : > { %v2139_v55 = vadd.f32 %v2138_v53, %v2137_v32  ;;  %v1117_v31 = vadd.f32 %v1116_v18, %v1115_v52 }
 0x423   : > { %v2140_v1 = vrot.slane %v2139_v55, 2  ;;  %v1118_v44 = vrot.slane %v1117_v31, 1 }
 0x425   : > { %v2141_v15 = vadd.f32 %v2140_v1, %v2139_v55  ;;  %v1119_v24 = vadd.f32 %v1118_v44, %v1117_v31 }
 0x427   : > { %2391 = vpush %v1119_v24  ;;  %v2142_v47 = vrot.slane %v2141_v15, 1 }
 0x428   : > { %2393 = vpush %v2086_v35 }
 0x429   : > { %v2143_v20 = vadd.f32 %v2142_v47, %v2141_v15 }
 0x42b   : > { %2395 = vpush %v2143_v20 }
 0x458   : > { %s2392_s16 = spop %2391 }
 0x459   : > { %s2394_s18 = spop %2393 }
 0x45a   : > { %s2088_s20 = sadd.f32 %s2394_s18, %s2392_s16 }
 0x45c   : > { %s2396_s24 = spop %2395 }
 0x45d   : > { %s2145_s27 = sadd.f32 %s2396_s24, %s2088_s20 }
 0x45f   : > { %v2150_v30 = vstv %s2145_s27 }
 0x460   : > { %v2151_v50 = vsel %vm2146_vm8, %v2150_v30, %v2149_v57 }
 0x461   : > { %2152 = vst [vmem:[%s176_s25] sm:$0xff] %v2151_v50 }
 0x462   : > { %2680 = shalt.err (!%p2677_p5)
}
 0x463   : > { %s2681_s7 = scalar_lea.hbm %s3982_s30, 128  ;;  %s2685_s16 = scalar_lea.hbm %s4031_s2, 256 }
 0x464   : > { %p2682_p6 = scmp.ne.s32.totalorder %s3982_s30, %s2681_s7  ;;  %p2686_p10 = scmp.lt.u32.totalorder %s3982_s30, %s4031_s2 }
 0x465   : > { %p2687_p11 = scmp.lt.u32.totalorder %s2685_s16, %s2681_s7  ;;  %p2689_p13 = scmp.lt.u32.totalorder %s2681_s7, %s3982_s30 }
 0x466   : > { %p2683_p7 = pnand %p2682_p6, %p2813_p4 }
 0x467   : > { %p2688_p12 = por %p2687_p11, %p2686_p10 }
 0x468   : > { %p2684_p9 = pneg %p2683_p7 }
 0x469   : > { %p2690_p0 = por %p2689_p13, %p2688_p12 }
 0x46b   : > { %p2691_p1 = pnand %p2690_p0, %p2684_p9 }
 0x46d   : > { %2694 = shalt.err (!%p2691_p1)
}
 0x46e   : > { %2397 = dma.vmem_to_hbm [thread:$0]  (%p2813_p4), %s3984_s26, 128, %s3982_s30, %s2154_s12  }
 0x46f PF: > { %p2403_p2 = scmp.ge.s32.totalorder %s2745_s14, 2  ;;  %s2180_s23 = sand.u32 1, %s2725_s9  }
 0x470   : > { %s2181_s24 = scalar_lea.sflag [#allocation3], %s2180_s23 }
 0x471   : > { %p2400_p3 = pnand %p2403_p2, %p2820_p8 }
 0x473   : > { %2720 = dma.done.wait (!%p2400_p3), %s2181_s24, 128  }
 0x474   : > { %2722 = vsyncadd (!%p2400_p3), %s2181_s24, 4294967168  ;;  %s15_s14 = sadd.s32 1, %s2745_s14   ;;  %s4046_s9 = smov %s2729_s10 }
 0x475   : > { %p12_p5 = scmp.ge.s32.totalorder %s15_s14, 4   ;;  %s4047_s10 = smov %s2733_s11 }
 0x476   : > { %s4048_s11 = smov %s2826_s22  ;;  %s4049_s12 = smov %s2741_s13 }
 0x477   : > { %s4050_s13 = smov %s4052_s17  ;;  %14 = sbr.rel (!%p12_p5) target bundleno = 4 (0x4), region = 66 }
 0x47e   :  { %2186 = vsyncpa [#allocation3], 1 }
 0x47f   :  { %2188 = vsyncpa [#allocation3 + $0x1], 1 }

</bundles_post_ra>
